<compile_context>
chip_gen: v7x
topology: tpu7x:2x2x1
jax: 0.10.0
libtpu: 0.0.40
codegen_flags: <defaults>
</compile_context>

<pallas_src>
import functools
import math

import numpy as np
import jax
import jax.numpy as jnp
from jax.experimental import pallas as pl
from jax.experimental.pallas import tpu as pltpu


# ----------------------------- args (mirrors argparse) -----------------------------
class Args:
    layers = 4
    sublayers = 2
    pos_level = 4
    depth_level = 4
    mlp = 2                 # seq1 has mlp+2 linear layers
    hidden = 32
    lrelu_slope = 0.01
    basis_order = 3
    basis_mlp = 1
    basis_hidden = 16
    basis_out = 4
    sigmoid_offset = 5.0
    render_depth = False    # TODO(synk): render_depth/Rainbow branch not implemented


args = Args()

_LANE = 128
_MXU_DTYPE = jnp.bfloat16   # bf16 into the MXU (f32 accumulate); elementwise stays f32


def _round_up(x, m):
    return (x + m - 1) // m * m


def _pick_tile(total, cands=(2048, 1024, 512, 256, 128)):
    """Largest candidate tile (multiple of 128) that divides `total`."""
    for c in cands:
        if total % c == 0:
            return c
    return _LANE


# ================================ Pallas kernels ====================================
def _fused_mlp_kernel(n_seq1, n_basis, slope, sig_off,
                      enc1_ref, enc2_ref, *refs):
    """Both MLPs, transposed layout (features x rows), rows lane-dense.

    Outputs: alpha = sigmoid(seq1[0] - off), coeff = tanh(seq1[1:]),
             basis = tanh(basis_mlp(enc2)).
    """
    n_wb = 2 * (n_seq1 + n_basis)
    wb = refs[:n_wb]
    alpha_ref, coeff_ref, basis_ref = refs[n_wb:n_wb + 3]

    def mlp(h, first, n_layers):
        for li in range(n_layers):
            w = wb[first + 2 * li][...]            # (out, in)  bf16
            b = wb[first + 2 * li + 1][...]        # (out, 1)   f32
            # bf16 operands into the MXU, f32 accumulation; bias/LeakyReLU in f32.
            h = jnp.dot(w, h.astype(w.dtype),
                        preferred_element_type=jnp.float32) + b
            if li < n_layers - 1:
                h = jnp.where(h > 0, h, slope * h)  # LeakyReLU
        return h

    # --- main (seq1) MLP: sigmoid / tanh heads fused ---
    h = mlp(enc1_ref[...], 0, n_seq1)               # (1 + 3*basis_out, tile) f32
    alpha_ref[...] = 1.0 / (1.0 + jnp.exp(sig_off - h[0:1, :]))   # sigmoid(h0 - off)
    coeff_ref[...] = jnp.tanh(h[1:, :])

    # --- basis MLP: tanh fused ---
    g = mlp(enc2_ref[...], 2 * n_seq1, n_basis)     # (basis_out, tile)
    basis_ref[...] = jnp.tanh(g)


def pallas_fused_mlp(enc1_t, enc2_t, seq1_w, seq1_b, basis_w, basis_b,
                     slope, sig_off):
    """enc1_t: (F1, rows), enc2_t: (F2, rows)  (rows on lanes).

    Weights stored PyTorch-style (out, in), biases (out, 1).
    Returns (alpha (1, rows), coeff (3*basis_out, rows), basis (basis_out, rows)).
    """
    f1, rows = enc1_t.shape
    f2 = enc2_t.shape[0]
    rows_pad = _round_up(rows, _LANE)
    if rows_pad != rows:                      # generic tail padding (no hard assert)
        enc1_t = jnp.pad(enc1_t, ((0, 0), (0, rows_pad - rows)))
        enc2_t = jnp.pad(enc2_t, ((0, 0), (0, rows_pad - rows)))
    tile = _pick_tile(rows_pad)

    n_seq1, n_basis = len(seq1_w), len(basis_w)
    out_seq1 = seq1_w[-1].shape[0]
    out_basis = basis_w[-1].shape[0]

    flat, wb_specs = [], []
    for w, b in zip(list(seq1_w) + list(basis_w), list(seq1_b) + list(basis_b)):
        flat += [w.astype(_MXU_DTYPE), b]
        wb_specs += [pl.BlockSpec(w.shape, lambda i: (0, 0)),
                     pl.BlockSpec(b.shape, lambda i: (0, 0))]

    alpha, coeff, basis = pl.pallas_call(
        functools.partial(_fused_mlp_kernel, n_seq1, n_basis, slope, sig_off),
        out_shape=(jax.ShapeDtypeStruct((1, rows_pad), jnp.float32),
                   jax.ShapeDtypeStruct((out_seq1 - 1, rows_pad), jnp.float32),
                   jax.ShapeDtypeStruct((out_basis, rows_pad), jnp.float32)),
        grid=(rows_pad // tile,),
        in_specs=[pl.BlockSpec((f1, tile), lambda i: (0, i)),
                  pl.BlockSpec((f2, tile), lambda i: (0, i))] + wb_specs,
        out_specs=[pl.BlockSpec((1, tile), lambda i: (0, i)),
                   pl.BlockSpec((out_seq1 - 1, tile), lambda i: (0, i)),
                   pl.BlockSpec((out_basis, tile), lambda i: (0, i))],
        compiler_params=pltpu.CompilerParams(
            dimension_semantics=("parallel",)),
    )(enc1_t, enc2_t, *flat)
    return alpha[:, :rows], coeff[:, :rows], basis[:, :rows]


def _composite_kernel(n_planes, n_sub, basis_out,
                      a_ref, rgb_ref, coeff_ref, basis_ref, out_ref):
    """Fused: illumination = sum_j coeff[c,j]*basis[j], rgb = clip(rgb+ill),
    exclusive-cumprod alpha compositing over planes.  Rays are lane-dense."""
    a = a_ref[...]          # (n, t)
    rgb = rgb_ref[...]      # (n, 3, t)
    coeff = coeff_ref[...]  # (n//n_sub, 3*basis_out, t)  (already tanh'd)
    bas = basis_ref[...]    # (n, basis_out, t)           (already tanh'd)

    t = a.shape[-1]
    acc = jnp.zeros((3, t), jnp.float32)
    trans = jnp.ones((1, t), jnp.float32)
    for i in range(n_planes):                    # small plane count -> static unroll
        a_i = a[i:i + 1]                         # (1, t)
        c_i = coeff[i // n_sub]                  # (3*basis_out, t)  (repeat_interleave)
        b_i = bas[i]                             # (basis_out, t)
        ill = jnp.concatenate(
            [jnp.sum(c_i[basis_out * c:basis_out * (c + 1)] * b_i,
                     axis=0, keepdims=True) for c in range(3)], axis=0)   # (3, t)
        rgb_i = jnp.clip(rgb[i] + ill, 0.0, 1.0)
        acc = acc + trans * rgb_i * a_i
        trans = trans * (1.0 - a_i)
    out_ref[...] = acc


def pallas_composite(alpha, rgb, coeff, basis, n_sub, basis_out):
    """alpha: (n, sel), rgb: (n, 3, sel), coeff: (n//n_sub, 3*bo, sel),
    basis: (n, bo, sel);  sel is a multiple of 128.  Returns (3, sel)."""
    n, sel = alpha.shape
    ng = coeff.shape[0]
    tile = _pick_tile(sel, cands=(1024, 512, 256, 128))
    return pl.pallas_call(
        functools.partial(_composite_kernel, n, n_sub, basis_out),
        out_shape=jax.ShapeDtypeStruct((3, sel), jnp.float32),
        grid=(sel // tile,),
        in_specs=[pl.BlockSpec((n, tile), lambda j: (0, j)),
                  pl.BlockSpec((n, 3, tile), lambda j: (0, 0, j)),
                  pl.BlockSpec((ng, 3 * basis_out, tile), lambda j: (0, 0, j)),
                  pl.BlockSpec((n, basis_out, tile), lambda j: (0, 0, j))],
        out_specs=pl.BlockSpec((3, tile), lambda j: (0, j)),
        compiler_params=pltpu.CompilerParams(
            dimension_semantics=("parallel",)),
    )(alpha, rgb, coeff, basis)


# ================================ JAX glue (geometry) ================================
def normalized(v, axis):
    return v / (jnp.linalg.norm(v, axis=axis, keepdims=True) + 1e-07)


def compute_homographies(sfm, feature, planes):
    fx, fy, px, py = feature["fx"], feature["fy"], feature["px"], feature["py"]
    new_r = feature["r"] @ sfm["ref_rT"]
    new_t = -new_r @ sfm["ref_t"] + feature["t"]
    n_vec = jnp.array([[0.0, 0.0, 1.0]], jnp.float32)
    Ha = new_r.T
    Hb = Ha @ new_t @ n_vec @ Ha
    Hc = (n_vec @ Ha @ new_t)[0]
    ki = jnp.linalg.inv(
        jnp.array([[fx, 0, px], [0, fy, py], [0, 0, 1.0]], jnp.float32))
    tt = sfm["ref_cam"]
    ref_k = jnp.array(
        [[tt["fx"], 0, tt["px"]], [0, tt["fy"], tt["py"]], [0, 0, 1.0]], jnp.float32)
    planes_mat = planes.reshape(-1, 1, 1)
    return ref_k @ (Ha + Hb / (-planes_mat - Hc)) @ ki


def compute_homo_warp(sfm, input_shape, input_offset, output_shape, selection,
                      feature, planes):
    coords = jnp.stack(
        [selection % output_shape[1], selection // output_shape[1],
         jnp.ones_like(selection)], -1).astype(jnp.float32)          # (sel, 3)
    Hs = compute_homographies(sfm, feature, planes)                  # (n, 3, 3)
    prod = coords @ jnp.transpose(Hs, (0, 2, 1))                     # (n, sel, 3)
    scale = jnp.array([input_shape[1] - 1, input_shape[0] - 1], jnp.float32)
    ref_coords = prod[:, :, :2] / prod[:, :, 2:]
    warp = (ref_coords + input_offset) / scale.reshape(1, 1, 2) * 2 - 1
    return warp[:, :, None], ref_coords                              # (n,sel,1,2), (n,sel,2)


def get_viewing_angle(sfm, feature, ref_coords, planes):
    camera = sfm["ref_rT"].T @ feature["center"] + sfm["ref_t"]      # (3,1)
    coords = jnp.transpose(ref_coords, (0, 2, 1))                    # (n,2,sel)
    coords = jnp.concatenate([coords, jnp.ones_like(coords[:, :1])], 1)
    xyz = coords * planes.reshape(-1, 1, 1)
    ki = jnp.linalg.inv(
        jnp.array([[feature["fx"], 0, feature["px"]],
                   [0, feature["fy"], feature["py"]],
                   [0, 0, 1.0]], jnp.float32))
    xyz = ki @ xyz
    inv_view = normalized(xyz - camera[None], 1)
    view = jnp.transpose(inv_view, (0, 2, 1))
    xyz_t = jnp.transpose(xyz, (0, 2, 1))
    return view[:, :, None], xyz_t[:, :, None]


def grid_sample_3d(vol, grid):
    """vol: (C, D, H, W); grid: (..., 3) (x,y,z) in [-1,1]; align_corners=True
    (matches the PyTorch call), zero padding.  Gather -> plain JAX glue."""
    C, D, H, W = vol.shape
    x = (grid[..., 0] + 1.0) * 0.5 * (W - 1)
    y = (grid[..., 1] + 1.0) * 0.5 * (H - 1)
    z = (grid[..., 2] + 1.0) * 0.5 * (D - 1)
    x0, y0, z0 = jnp.floor(x), jnp.floor(y), jnp.floor(z)
    x1, y1, z1 = x0 + 1, y0 + 1, z0 + 1
    wx, wy, wz = x - x0, y - y0, z - z0

    def fetch(xi, yi, zi):
        valid = ((xi >= 0) & (xi <= W - 1) & (yi >= 0) & (yi <= H - 1)
                 & (zi >= 0) & (zi <= D - 1))
        xc = jnp.clip(xi, 0, W - 1).astype(jnp.int32)
        yc = jnp.clip(yi, 0, H - 1).astype(jnp.int32)
        zc = jnp.clip(zi, 0, D - 1).astype(jnp.int32)
        return vol[:, zc, yc, xc] * valid.astype(vol.dtype)[None]

    def lerp(a, b, w):
        return a * (1 - w) + b * w

    c00 = lerp(fetch(x0, y0, z0), fetch(x1, y0, z0), wx[None])
    c10 = lerp(fetch(x0, y1, z0), fetch(x1, y1, z0), wx[None])
    c01 = lerp(fetch(x0, y0, z1), fetch(x1, y0, z1), wx[None])
    c11 = lerp(fetch(x0, y1, z1), fetch(x1, y1, z1), wx[None])
    c0 = lerp(c00, c10, wy[None])
    c1 = lerp(c01, c11, wy[None])
    return lerp(c0, c1, wz[None])


# ================================ model forward ======================================
def network_forward(params, sfm, feature, output_shape, selection):
    planes = params["planes"]
    shape_hw = params["shape"]
    n_rays = selection.shape[0]

    # Pad rays to a lane multiple so every Pallas array is lane-dense; padded rays
    # compute valid-but-unused values and are sliced off at the end.
    sel_pad = _round_up(max(n_rays, _LANE), _LANE)
    selection_p = jnp.pad(selection, (0, sel_pad - n_rays))

    warp, ref_coords = compute_homo_warp(
        sfm, shape_hw, sfm["offset"], output_shape, selection_p, feature, planes)
    n, sel = warp.shape[0], warp.shape[1]
    rows = n * sel

    # --- seq1 positional encoding (thin XLA; sin/cos of tiny arrays) ---
    pos_freq = jnp.array([0.5 * np.pi * 2 ** i for i in range(args.pos_level)] * 2,
                         jnp.float32).reshape(1, 1, 1, 2, -1)
    depth_freq = jnp.array([0.5 * np.pi * 2 ** i for i in range(args.depth_level)],
                           jnp.float32).reshape(1, 1, 1, -1)
    z_coords = jnp.linspace(-1, 1, args.layers * args.sublayers,
                            dtype=jnp.float32).reshape(-1, 1, 1, 1)
    vxy = (warp[:, :, :, :, None] * pos_freq).reshape(n, sel, 1, -1)
    vz = jnp.ones_like(warp[:, :, :, :1]) * z_coords * depth_freq
    vxyz = jnp.concatenate([vxy, vz], -1)                            # (n,sel,1,12)
    enc1 = jnp.concatenate([jnp.sin(vxyz), jnp.cos(vxyz)], -1)       # (n,sel,1,24)
    enc1_t = enc1.reshape(rows, -1).T                                # (24, rows)

    # --- basis viewing-angle encoding ---
    vi, _xyz = get_viewing_angle(sfm, feature, ref_coords, planes)   # (n,sel,1,3)
    freq_view = jnp.array([0.5 * np.pi * 2.0 ** i for i in range(args.basis_order)],
                          jnp.float32).reshape(1, 1, 1, 1, -1)
    big = (vi[..., :2, None] * freq_view).reshape(n, sel, 1, -1)     # (n,sel,1,6)
    enc2 = jnp.concatenate([jnp.sin(big), jnp.cos(big)], -1)         # (n,sel,1,12)
    enc2_t = enc2.reshape(rows, -1).T                                # (12, rows)

    # --- fused MLPs (Pallas): seq1 + basis, sigmoid/tanh heads fused ---
    alpha_t, coeff_t, basis_t = pallas_fused_mlp(
        enc1_t, enc2_t, params["seq1_w"], params["seq1_b"],
        params["basis_w"], params["basis_b"],
        args.lrelu_slope, args.sigmoid_offset)

    alpha = alpha_t.reshape(n, sel)                                  # sigmoid(a - off)
    # cof = out[::sublayers, ..., 1:] (tanh commutes with the selection/repeat)
    coeff = jnp.transpose(coeff_t.reshape(-1, n, sel)[:, ::args.sublayers, :],
                          (1, 0, 2))                                 # (layers, 3*bo, sel)
    basis = jnp.transpose(basis_t.reshape(-1, n, sel), (1, 0, 2))    # (n, bo, sel)

    # --- MPI color sampling (3-D grid_sample, data-dependent gather -> JAX glue) ---
    # TODO(synk): pin sigmoided MPI volume in VMEM and gather in-kernel.
    mpi_sig = jax.nn.sigmoid(params["mpi_c"])                        # (L,3,H,W)
    mpi_sig3d = jnp.transpose(mpi_sig, (1, 0, 2, 3))                 # (3,L,H,W)
    depths = jnp.repeat(jnp.linspace(-1, 1, args.layers, dtype=jnp.float32),
                        args.sublayers).reshape(-1, 1, 1, 1)
    warp3d = jnp.concatenate([warp, jnp.ones_like(warp[..., :1]) * depths], -1)
    samples = grid_sample_3d(mpi_sig3d, warp3d[:, :, 0, :])          # (3,n,sel)
    rgb = jnp.transpose(samples, (1, 0, 2))                          # (n,3,sel)

    # --- fused illumination + clamp + alpha compositing (Pallas) ---
    out = pallas_composite(alpha, rgb, coeff, basis,
                           args.sublayers, args.basis_out)           # (3, sel)
    return out[:, :n_rays][None, :, :, None]                         # (1,3,rays,1)


# ================================ parameter init =====================================
def init_linear(key, fan_in, fan_out):
    kw, kb = jax.random.split(key)
    lim = 1.0 / math.sqrt(fan_in)
    # PyTorch nn.Linear layout: weight (out, in), bias (out,) -> stored (out, 1)
    w = jax.random.uniform(kw, (fan_out, fan_in), jnp.float32, -lim, lim)
    b = jax.random.uniform(kb, (fan_out, 1), jnp.float32, -lim, lim)
    return w, b


def init_mlp(key, dims):
    ws, bs = [], []
    for k, din, dout in zip(jax.random.split(key, len(dims) - 1), dims[:-1], dims[1:]):
        w, b = init_linear(k, din, dout)
        ws.append(w)
        bs.append(b)
    return ws, bs


def get_planes(dmin, dmax, n):
    return jnp.linspace(dmin, dmax, n, dtype=jnp.float32)


def build_params(key, mpi_shape):
    k_mpi, k_seq1, k_basis = jax.random.split(key, 3)
    L, _, H, W = mpi_shape
    mpi_c = jax.random.uniform(k_mpi, (L, 3, H, W), jnp.float32, -1.0, 1.0)

    in_seq1 = 4 * args.pos_level + 2 * args.depth_level               # sin/cos encoding
    out_seq1 = 1 + args.basis_out * 3
    seq1_dims = [in_seq1] + [args.hidden] * (args.mlp + 1) + [out_seq1]
    seq1_w, seq1_b = init_mlp(k_seq1, seq1_dims)

    in_basis = args.basis_order * 4
    basis_dims = [in_basis] + [args.basis_hidden] * (args.basis_mlp + 1) + [args.basis_out]
    basis_w, basis_b = init_mlp(k_basis, basis_dims)

    planes = get_planes(1.0, 10.0, args.layers * args.sublayers)
    return dict(mpi_c=mpi_c, seq1_w=seq1_w, seq1_b=seq1_b,
                basis_w=basis_w, basis_b=basis_b,
                planes=planes, shape=[H, W])


# ===================================== main ==========================================
if __name__ == "__main__":
    key = jax.random.PRNGKey(0)
    k_params, k_sel = jax.random.split(key)

    H = W = 16
    mpi_shape = (args.layers, 3, H, W)
    params = build_params(k_params, mpi_shape)

    fx = fy = 20.0
    px = py = 8.0
    theta = 0.05
    rot = jnp.array([[math.cos(theta), -math.sin(theta), 0.0],
                     [math.sin(theta), math.cos(theta), 0.0],
                     [0.0, 0.0, 1.0]], jnp.float32)

    sfm = dict(
        ref_rT=jnp.eye(3, dtype=jnp.float32),
        ref_t=jnp.array([[0.0], [0.0], [0.0]], jnp.float32),
        ref_cam=dict(fx=fx, fy=fy, px=px, py=py),
        offset=0.0,
    )
    feature = dict(
        r=rot,
        t=jnp.array([[0.05], [-0.02], [0.01]], jnp.float32),
        center=jnp.array([[0.5], [0.3], [-1.0]], jnp.float32),
        fx=fx, fy=fy, px=px, py=py,
    )

    output_shape = [H, W]
    n_rays = 64  # padded to 128 lanes internally -> 8*128 = 1024 lane-dense MLP rows
    selection = jax.random.randint(k_sel, (n_rays,), 0, H * W, dtype=jnp.int32)

    out = network_forward(params, sfm, feature, output_shape, selection)
    out = jax.block_until_ready(out)
    assert out.shape == (1, 3, n_rays, 1), out.shape
    assert bool(jnp.all(jnp.isfinite(out)))
    print("KERNEL_OK")
</pallas_src>

<mosaic_0001>
module attributes {stable_mosaic.version = 11 : i64} {
  func.func @_fused_mlp_kernel(%arg0: i32, %arg1: memref<24x1024xf32, #tpu.memory_space<vmem>>, %arg2: memref<12x1024xf32, #tpu.memory_space<vmem>>, %arg3: memref<32x24xbf16, #tpu.memory_space<vmem>>, %arg4: memref<32x1xf32, #tpu.memory_space<vmem>>, %arg5: memref<32x32xbf16, #tpu.memory_space<vmem>>, %arg6: memref<32x1xf32, #tpu.memory_space<vmem>>, %arg7: memref<32x32xbf16, #tpu.memory_space<vmem>>, %arg8: memref<32x1xf32, #tpu.memory_space<vmem>>, %arg9: memref<13x32xbf16, #tpu.memory_space<vmem>>, %arg10: memref<13x1xf32, #tpu.memory_space<vmem>>, %arg11: memref<16x12xbf16, #tpu.memory_space<vmem>>, %arg12: memref<16x1xf32, #tpu.memory_space<vmem>>, %arg13: memref<16x16xbf16, #tpu.memory_space<vmem>>, %arg14: memref<16x1xf32, #tpu.memory_space<vmem>>, %arg15: memref<4x16xbf16, #tpu.memory_space<vmem>>, %arg16: memref<4x1xf32, #tpu.memory_space<vmem>>, %arg17: memref<1x1024xf32, #tpu.memory_space<vmem>>, %arg18: memref<12x1024xf32, #tpu.memory_space<vmem>>, %arg19: memref<4x1024xf32, #tpu.memory_space<vmem>>) attributes {dimension_semantics = [#tpu.dimension_semantics<parallel>], iteration_bounds = array<i64: 1>, scalar_prefetch = 0 : i64, scratch_operands = 0 : i64, tpu.core_type = #tpu.core_type<tc>, window_params = [{transform_indices = @transform_0, window_bounds = array<i64: 24, 1024>}, {transform_indices = @transform_1, window_bounds = array<i64: 12, 1024>}, {pipeline_mode = #tpu.pipeline_mode<synchronous>, transform_indices = @transform_2, window_bounds = array<i64: 32, 24>}, {pipeline_mode = #tpu.pipeline_mode<synchronous>, transform_indices = @transform_3, window_bounds = array<i64: 32, 1>}, {pipeline_mode = #tpu.pipeline_mode<synchronous>, transform_indices = @transform_4, window_bounds = array<i64: 32, 32>}, {pipeline_mode = #tpu.pipeline_mode<synchronous>, transform_indices = @transform_5, window_bounds = array<i64: 32, 1>}, {pipeline_mode = #tpu.pipeline_mode<synchronous>, transform_indices = @transform_6, window_bounds = array<i64: 32, 32>}, {pipeline_mode = #tpu.pipeline_mode<synchronous>, transform_indices = @transform_7, window_bounds = array<i64: 32, 1>}, {pipeline_mode = #tpu.pipeline_mode<synchronous>, transform_indices = @transform_8, window_bounds = array<i64: 13, 32>}, {pipeline_mode = #tpu.pipeline_mode<synchronous>, transform_indices = @transform_9, window_bounds = array<i64: 13, 1>}, {pipeline_mode = #tpu.pipeline_mode<synchronous>, transform_indices = @transform_10, window_bounds = array<i64: 16, 12>}, {pipeline_mode = #tpu.pipeline_mode<synchronous>, transform_indices = @transform_11, window_bounds = array<i64: 16, 1>}, {pipeline_mode = #tpu.pipeline_mode<synchronous>, transform_indices = @transform_12, window_bounds = array<i64: 16, 16>}, {pipeline_mode = #tpu.pipeline_mode<synchronous>, transform_indices = @transform_13, window_bounds = array<i64: 16, 1>}, {pipeline_mode = #tpu.pipeline_mode<synchronous>, transform_indices = @transform_14, window_bounds = array<i64: 4, 16>}, {pipeline_mode = #tpu.pipeline_mode<synchronous>, transform_indices = @transform_15, window_bounds = array<i64: 4, 1>}, {transform_indices = @transform_16, window_bounds = array<i64: 1, 1024>}, {transform_indices = @transform_17, window_bounds = array<i64: 12, 1024>}, {transform_indices = @transform_18, window_bounds = array<i64: 4, 1024>}]} {
    %c0 = arith.constant 0 : index
    %c0_0 = arith.constant 0 : index
    %0 = vector.load %arg1[%c0, %c0_0] : memref<24x1024xf32, #tpu.memory_space<vmem>>, vector<24x1024xf32>
    %c0_1 = arith.constant 0 : index
    %c0_2 = arith.constant 0 : index
    %1 = vector.load %arg3[%c0_1, %c0_2] : memref<32x24xbf16, #tpu.memory_space<vmem>>, vector<32x24xbf16>
    %c0_3 = arith.constant 0 : index
    %c0_4 = arith.constant 0 : index
    %2 = vector.load %arg4[%c0_3, %c0_4] : memref<32x1xf32, #tpu.memory_space<vmem>>, vector<32x1xf32>
    %3 = arith.truncf %0 : vector<24x1024xf32> to vector<24x1024xbf16>
    %cst = arith.constant dense<0.000000e+00> : vector<32x1024xf32>
    %4 = tpu.matmul %1, %3, %cst {dimension_numbers = #tpu.dot_dimension_numbers<[1], [0], [0], [1], [0, 0, 1, 1], [], []>} : vector<32x24xbf16>, vector<24x1024xbf16>, vector<32x1024xf32> -> vector<32x1024xf32>
    %5 = vector.broadcast %2 : vector<32x1xf32> to vector<32x1024xf32>
    %6 = arith.addf %4, %5 : vector<32x1024xf32>
    %cst_5 = arith.constant 0.000000e+00 : f32
    %7 = vector.broadcast %cst_5 : f32 to vector<32x1024xf32>
    %8 = arith.cmpf ogt, %6, %7 : vector<32x1024xf32>
    %cst_6 = arith.constant 0.00999999977 : f32
    %9 = vector.broadcast %cst_6 : f32 to vector<32x1024xf32>
    %10 = arith.mulf %9, %6 : vector<32x1024xf32>
    %11 = arith.select %8, %6, %10 : vector<32x1024xi1>, vector<32x1024xf32>
    %c0_7 = arith.constant 0 : index
    %c0_8 = arith.constant 0 : index
    %12 = vector.load %arg5[%c0_7, %c0_8] : memref<32x32xbf16, #tpu.memory_space<vmem>>, vector<32x32xbf16>
    %c0_9 = arith.constant 0 : index
    %c0_10 = arith.constant 0 : index
    %13 = vector.load %arg6[%c0_9, %c0_10] : memref<32x1xf32, #tpu.memory_space<vmem>>, vector<32x1xf32>
    %14 = arith.truncf %11 : vector<32x1024xf32> to vector<32x1024xbf16>
    %cst_11 = arith.constant dense<0.000000e+00> : vector<32x1024xf32>
    %15 = tpu.matmul %12, %14, %cst_11 {dimension_numbers = #tpu.dot_dimension_numbers<[1], [0], [0], [1], [0, 0, 1, 1], [], []>} : vector<32x32xbf16>, vector<32x1024xbf16>, vector<32x1024xf32> -> vector<32x1024xf32>
    %16 = vector.broadcast %13 : vector<32x1xf32> to vector<32x1024xf32>
    %17 = arith.addf %15, %16 : vector<32x1024xf32>
    %cst_12 = arith.constant 0.000000e+00 : f32
    %18 = vector.broadcast %cst_12 : f32 to vector<32x1024xf32>
    %19 = arith.cmpf ogt, %17, %18 : vector<32x1024xf32>
    %cst_13 = arith.constant 0.00999999977 : f32
    %20 = vector.broadcast %cst_13 : f32 to vector<32x1024xf32>
    %21 = arith.mulf %20, %17 : vector<32x1024xf32>
    %22 = arith.select %19, %17, %21 : vector<32x1024xi1>, vector<32x1024xf32>
    %c0_14 = arith.constant 0 : index
    %c0_15 = arith.constant 0 : index
    %23 = vector.load %arg7[%c0_14, %c0_15] : memref<32x32xbf16, #tpu.memory_space<vmem>>, vector<32x32xbf16>
    %c0_16 = arith.constant 0 : index
    %c0_17 = arith.constant 0 : index
    %24 = vector.load %arg8[%c0_16, %c0_17] : memref<32x1xf32, #tpu.memory_space<vmem>>, vector<32x1xf32>
    %25 = arith.truncf %22 : vector<32x1024xf32> to vector<32x1024xbf16>
    %cst_18 = arith.constant dense<0.000000e+00> : vector<32x1024xf32>
    %26 = tpu.matmul %23, %25, %cst_18 {dimension_numbers = #tpu.dot_dimension_numbers<[1], [0], [0], [1], [0, 0, 1, 1], [], []>} : vector<32x32xbf16>, vector<32x1024xbf16>, vector<32x1024xf32> -> vector<32x1024xf32>
    %27 = vector.broadcast %24 : vector<32x1xf32> to vector<32x1024xf32>
    %28 = arith.addf %26, %27 : vector<32x1024xf32>
    %cst_19 = arith.constant 0.000000e+00 : f32
    %29 = vector.broadcast %cst_19 : f32 to vector<32x1024xf32>
    %30 = arith.cmpf ogt, %28, %29 : vector<32x1024xf32>
    %cst_20 = arith.constant 0.00999999977 : f32
    %31 = vector.broadcast %cst_20 : f32 to vector<32x1024xf32>
    %32 = arith.mulf %31, %28 : vector<32x1024xf32>
    %33 = arith.select %30, %28, %32 : vector<32x1024xi1>, vector<32x1024xf32>
    %c0_21 = arith.constant 0 : index
    %c0_22 = arith.constant 0 : index
    %34 = vector.load %arg9[%c0_21, %c0_22] : memref<13x32xbf16, #tpu.memory_space<vmem>>, vector<13x32xbf16>
    %c0_23 = arith.constant 0 : index
    %c0_24 = arith.constant 0 : index
    %35 = vector.load %arg10[%c0_23, %c0_24] : memref<13x1xf32, #tpu.memory_space<vmem>>, vector<13x1xf32>
    %36 = arith.truncf %33 : vector<32x1024xf32> to vector<32x1024xbf16>
    %cst_25 = arith.constant dense<0.000000e+00> : vector<13x1024xf32>
    %37 = tpu.matmul %34, %36, %cst_25 {dimension_numbers = #tpu.dot_dimension_numbers<[1], [0], [0], [1], [0, 0, 1, 1], [], []>} : vector<13x32xbf16>, vector<32x1024xbf16>, vector<13x1024xf32> -> vector<13x1024xf32>
    %38 = vector.broadcast %35 : vector<13x1xf32> to vector<13x1024xf32>
    %39 = arith.addf %37, %38 : vector<13x1024xf32>
    %40 = vector.extract_strided_slice %39 {offsets = [0, 0], sizes = [1, 1024], strides = [1, 1]} : vector<13x1024xf32> to vector<1x1024xf32>
    %cst_26 = arith.constant 5.000000e+00 : f32
    %41 = vector.broadcast %cst_26 : f32 to vector<1x1024xf32>
    %42 = arith.subf %41, %40 : vector<1x1024xf32>
    %43 = math.exp %42 : vector<1x1024xf32>
    %cst_27 = arith.constant 1.000000e+00 : f32
    %44 = vector.broadcast %cst_27 : f32 to vector<1x1024xf32>
    %45 = arith.addf %44, %43 : vector<1x1024xf32>
    %cst_28 = arith.constant 1.000000e+00 : f32
    %46 = vector.broadcast %cst_28 : f32 to vector<1x1024xf32>
    %47 = arith.divf %46, %45 : vector<1x1024xf32>
    %c0_29 = arith.constant 0 : index
    %c0_30 = arith.constant 0 : index
    %48 = vector.load %arg17[%c0_29, %c0_30] : memref<1x1024xf32, #tpu.memory_space<vmem>>, vector<1x1024xf32>
    tpu.vector_store %arg17[%c0_29, %c0_30], %47 {strides = array<i32>} : memref<1x1024xf32, #tpu.memory_space<vmem>>, vector<1x1024xf32>,
    %49 = vector.extract_strided_slice %39 {offsets = [1, 0], sizes = [12, 1024], strides = [1, 1]} : vector<13x1024xf32> to vector<12x1024xf32>
    %50 = math.tanh %49 : vector<12x1024xf32>
    %c0_31 = arith.constant 0 : index
    %c0_32 = arith.constant 0 : index
    %51 = vector.load %arg18[%c0_31, %c0_32] : memref<12x1024xf32, #tpu.memory_space<vmem>>, vector<12x1024xf32>
    tpu.vector_store %arg18[%c0_31, %c0_32], %50 {strides = array<i32>} : memref<12x1024xf32, #tpu.memory_space<vmem>>, vector<12x1024xf32>,
    %c0_33 = arith.constant 0 : index
    %c0_34 = arith.constant 0 : index
    %52 = vector.load %arg2[%c0_33, %c0_34] : memref<12x1024xf32, #tpu.memory_space<vmem>>, vector<12x1024xf32>
    %c0_35 = arith.constant 0 : index
    %c0_36 = arith.constant 0 : index
    %53 = vector.load %arg11[%c0_35, %c0_36] : memref<16x12xbf16, #tpu.memory_space<vmem>>, vector<16x12xbf16>
    %c0_37 = arith.constant 0 : index
    %c0_38 = arith.constant 0 : index
    %54 = vector.load %arg12[%c0_37, %c0_38] : memref<16x1xf32, #tpu.memory_space<vmem>>, vector<16x1xf32>
    %55 = arith.truncf %52 : vector<12x1024xf32> to vector<12x1024xbf16>
    %cst_39 = arith.constant dense<0.000000e+00> : vector<16x1024xf32>
    %56 = tpu.matmul %53, %55, %cst_39 {dimension_numbers = #tpu.dot_dimension_numbers<[1], [0], [0], [1], [0, 0, 1, 1], [], []>} : vector<16x12xbf16>, vector<12x1024xbf16>, vector<16x1024xf32> -> vector<16x1024xf32>
    %57 = vector.broadcast %54 : vector<16x1xf32> to vector<16x1024xf32>
    %58 = arith.addf %56, %57 : vector<16x1024xf32>
    %cst_40 = arith.constant 0.000000e+00 : f32
    %59 = vector.broadcast %cst_40 : f32 to vector<16x1024xf32>
    %60 = arith.cmpf ogt, %58, %59 : vector<16x1024xf32>
    %cst_41 = arith.constant 0.00999999977 : f32
    %61 = vector.broadcast %cst_41 : f32 to vector<16x1024xf32>
    %62 = arith.mulf %61, %58 : vector<16x1024xf32>
    %63 = arith.select %60, %58, %62 : vector<16x1024xi1>, vector<16x1024xf32>
    %c0_42 = arith.constant 0 : index
    %c0_43 = arith.constant 0 : index
    %64 = vector.load %arg13[%c0_42, %c0_43] : memref<16x16xbf16, #tpu.memory_space<vmem>>, vector<16x16xbf16>
    %c0_44 = arith.constant 0 : index
    %c0_45 = arith.constant 0 : index
    %65 = vector.load %arg14[%c0_44, %c0_45] : memref<16x1xf32, #tpu.memory_space<vmem>>, vector<16x1xf32>
    %66 = arith.truncf %63 : vector<16x1024xf32> to vector<16x1024xbf16>
    %cst_46 = arith.constant dense<0.000000e+00> : vector<16x1024xf32>
    %67 = tpu.matmul %64, %66, %cst_46 {dimension_numbers = #tpu.dot_dimension_numbers<[1], [0], [0], [1], [0, 0, 1, 1], [], []>} : vector<16x16xbf16>, vector<16x1024xbf16>, vector<16x1024xf32> -> vector<16x1024xf32>
    %68 = vector.broadcast %65 : vector<16x1xf32> to vector<16x1024xf32>
    %69 = arith.addf %67, %68 : vector<16x1024xf32>
    %cst_47 = arith.constant 0.000000e+00 : f32
    %70 = vector.broadcast %cst_47 : f32 to vector<16x1024xf32>
    %71 = arith.cmpf ogt, %69, %70 : vector<16x1024xf32>
    %cst_48 = arith.constant 0.00999999977 : f32
    %72 = vector.broadcast %cst_48 : f32 to vector<16x1024xf32>
    %73 = arith.mulf %72, %69 : vector<16x1024xf32>
    %74 = arith.select %71, %69, %73 : vector<16x1024xi1>, vector<16x1024xf32>
    %c0_49 = arith.constant 0 : index
    %c0_50 = arith.constant 0 : index
    %75 = vector.load %arg15[%c0_49, %c0_50] : memref<4x16xbf16, #tpu.memory_space<vmem>>, vector<4x16xbf16>
    %c0_51 = arith.constant 0 : index
    %c0_52 = arith.constant 0 : index
    %76 = vector.load %arg16[%c0_51, %c0_52] : memref<4x1xf32, #tpu.memory_space<vmem>>, vector<4x1xf32>
    %77 = arith.truncf %74 : vector<16x1024xf32> to vector<16x1024xbf16>
    %cst_53 = arith.constant dense<0.000000e+00> : vector<4x1024xf32>
    %78 = tpu.matmul %75, %77, %cst_53 {dimension_numbers = #tpu.dot_dimension_numbers<[1], [0], [0], [1], [0, 0, 1, 1], [], []>} : vector<4x16xbf16>, vector<16x1024xbf16>, vector<4x1024xf32> -> vector<4x1024xf32>
    %79 = vector.broadcast %76 : vector<4x1xf32> to vector<4x1024xf32>
    %80 = arith.addf %78, %79 : vector<4x1024xf32>
    %81 = math.tanh %80 : vector<4x1024xf32>
    %c0_54 = arith.constant 0 : index
    %c0_55 = arith.constant 0 : index
    %82 = vector.load %arg19[%c0_54, %c0_55] : memref<4x1024xf32, #tpu.memory_space<vmem>>, vector<4x1024xf32>
    tpu.vector_store %arg19[%c0_54, %c0_55], %81 {strides = array<i32>} : memref<4x1024xf32, #tpu.memory_space<vmem>>, vector<4x1024xf32>,
    return
  }
  func.func @transform_0(%arg0: i32) -> (i32, i32) {
    %c0_i32 = arith.constant 0 : i32
    %c0_i32_0 = arith.constant 0 : i32
    return %c0_i32, %arg0 : i32, i32
  }
  func.func @transform_1(%arg0: i32) -> (i32, i32) {
    %c0_i32 = arith.constant 0 : i32
    %c0_i32_0 = arith.constant 0 : i32
    return %c0_i32, %arg0 : i32, i32
  }
  func.func @transform_2(%arg0: i32) -> (i32, i32) {
    %c0_i32 = arith.constant 0 : i32
    %c0_i32_0 = arith.constant 0 : i32
    %c0_i32_1 = arith.constant 0 : i32
    return %c0_i32, %c0_i32_0 : i32, i32
  }
  func.func @transform_3(%arg0: i32) -> (i32, i32) {
    %c0_i32 = arith.constant 0 : i32
    %c0_i32_0 = arith.constant 0 : i32
    %c0_i32_1 = arith.constant 0 : i32
    return %c0_i32, %c0_i32_0 : i32, i32
  }
  func.func @transform_4(%arg0: i32) -> (i32, i32) {
    %c0_i32 = arith.constant 0 : i32
    %c0_i32_0 = arith.constant 0 : i32
    %c0_i32_1 = arith.constant 0 : i32
    return %c0_i32, %c0_i32_0 : i32, i32
  }
  func.func @transform_5(%arg0: i32) -> (i32, i32) {
    %c0_i32 = arith.constant 0 : i32
    %c0_i32_0 = arith.constant 0 : i32
    %c0_i32_1 = arith.constant 0 : i32
    return %c0_i32, %c0_i32_0 : i32, i32
  }
  func.func @transform_6(%arg0: i32) -> (i32, i32) {
    %c0_i32 = arith.constant 0 : i32
    %c0_i32_0 = arith.constant 0 : i32
    %c0_i32_1 = arith.constant 0 : i32
    return %c0_i32, %c0_i32_0 : i32, i32
  }
  func.func @transform_7(%arg0: i32) -> (i32, i32) {
    %c0_i32 = arith.constant 0 : i32
    %c0_i32_0 = arith.constant 0 : i32
    %c0_i32_1 = arith.constant 0 : i32
    return %c0_i32, %c0_i32_0 : i32, i32
  }
  func.func @transform_8(%arg0: i32) -> (i32, i32) {
    %c0_i32 = arith.constant 0 : i32
    %c0_i32_0 = arith.constant 0 : i32
    %c0_i32_1 = arith.constant 0 : i32
    return %c0_i32, %c0_i32_0 : i32, i32
  }
  func.func @transform_9(%arg0: i32) -> (i32, i32) {
    %c0_i32 = arith.constant 0 : i32
    %c0_i32_0 = arith.constant 0 : i32
    %c0_i32_1 = arith.constant 0 : i32
    return %c0_i32, %c0_i32_0 : i32, i32
  }
  func.func @transform_10(%arg0: i32) -> (i32, i32) {
    %c0_i32 = arith.constant 0 : i32
    %c0_i32_0 = arith.constant 0 : i32
    %c0_i32_1 = arith.constant 0 : i32
    return %c0_i32, %c0_i32_0 : i32, i32
  }
  func.func @transform_11(%arg0: i32) -> (i32, i32) {
    %c0_i32 = arith.constant 0 : i32
    %c0_i32_0 = arith.constant 0 : i32
    %c0_i32_1 = arith.constant 0 : i32
    return %c0_i32, %c0_i32_0 : i32, i32
  }
  func.func @transform_12(%arg0: i32) -> (i32, i32) {
    %c0_i32 = arith.constant 0 : i32
    %c0_i32_0 = arith.constant 0 : i32
    %c0_i32_1 = arith.constant 0 : i32
    return %c0_i32, %c0_i32_0 : i32, i32
  }
  func.func @transform_13(%arg0: i32) -> (i32, i32) {
    %c0_i32 = arith.constant 0 : i32
    %c0_i32_0 = arith.constant 0 : i32
    %c0_i32_1 = arith.constant 0 : i32
    return %c0_i32, %c0_i32_0 : i32, i32
  }
  func.func @transform_14(%arg0: i32) -> (i32, i32) {
    %c0_i32 = arith.constant 0 : i32
    %c0_i32_0 = arith.constant 0 : i32
    %c0_i32_1 = arith.constant 0 : i32
    return %c0_i32, %c0_i32_0 : i32, i32
  }
  func.func @transform_15(%arg0: i32) -> (i32, i32) {
    %c0_i32 = arith.constant 0 : i32
    %c0_i32_0 = arith.constant 0 : i32
    %c0_i32_1 = arith.constant 0 : i32
    return %c0_i32, %c0_i32_0 : i32, i32
  }
  func.func @transform_16(%arg0: i32) -> (i32, i32) {
    %c0_i32 = arith.constant 0 : i32
    %c0_i32_0 = arith.constant 0 : i32
    return %c0_i32, %arg0 : i32, i32
  }
  func.func @transform_17(%arg0: i32) -> (i32, i32) {
    %c0_i32 = arith.constant 0 : i32
    %c0_i32_0 = arith.constant 0 : i32
    return %c0_i32, %arg0 : i32, i32
  }
  func.func @transform_18(%arg0: i32) -> (i32, i32) {
    %c0_i32 = arith.constant 0 : i32
    %c0_i32_0 = arith.constant 0 : i32
    return %c0_i32, %arg0 : i32, i32
  }
}

</mosaic_0001>

<bundles_post_ra>
// kernel: tpu_custom_call.1
= control target key start
LH: loop header
LB: loop body
LE: loop exit
PB: predicated region body
PF: predicated region fallthrough
CT: control target
= control target key end

     0   :  { %s3628_s0 = inlined_call_operand.hbm [shape: f32[24,1024], index: 0, kind: input, shape index: {}]   ;;  %s3629_s1 = inlined_call_operand.vmem [shape: f32[12,1024], index: 1, kind: input, shape index: {}]   ;;  %s3630_s2 = inlined_call_operand.vmem [shape: bf16[32,24], index: 2, kind: input, shape index: {}]   ;;  %s3631_s3 = inlined_call_operand.vmem [shape: f32[32,1], index: 3, kind: input, shape index: {}]   ;;  %s3632_s4 = inlined_call_operand.vmem [shape: bf16[32,32], index: 4, kind: input, shape index: {}]   ;;  %s3633_s5 = inlined_call_operand.vmem [shape: f32[32,1], index: 5, kind: input, shape index: {}]   ;;  %s3634_s6 = inlined_call_operand.vmem [shape: bf16[32,32], index: 6, kind: input, shape index: {}]   ;;  %s3635_s7 = inlined_call_operand.vmem [shape: f32[32,1], index: 7, kind: input, shape index: {}]   ;;  %s3636_s8 = inlined_call_operand.vmem [shape: bf16[13,32], index: 8, kind: input, shape index: {}]   ;;  %s3637_s9 = inlined_call_operand.vmem [shape: f32[13,1], index: 9, kind: input, shape index: {}]   ;;  %s3638_s10 = inlined_call_operand.vmem [shape: bf16[16,12], index: 10, kind: input, shape index: {}]   ;;  %s3639_s11 = inlined_call_operand.vmem [shape: f32[16,1], index: 11, kind: input, shape index: {}]   ;;  %s3640_s12 = inlined_call_operand.vmem [shape: bf16[16,16], index: 12, kind: input, shape index: {}]   ;;  %s3641_s13 = inlined_call_operand.vmem [shape: f32[16,1], index: 13, kind: input, shape index: {}]   ;;  %s3642_s14 = inlined_call_operand.vmem [shape: bf16[4,16], index: 14, kind: input, shape index: {}]   ;;  %s3643_s15 = inlined_call_operand.vmem [shape: f32[4,1], index: 15, kind: input, shape index: {}]   ;;  %s3644_s16 = inlined_call_operand.hbm [shape: f32[1,1024], index: 16, kind: output, shape index: {0}]   ;;  %s3645_s17 = inlined_call_operand.hbm [shape: f32[12,1024], index: 17, kind: output, shape index: {1}]   ;;  %s3646_s18 = inlined_call_operand.hbm [shape: f32[4,1024], index: 18, kind: output, shape index: {2}]  }
   0x1   :  { %3650 = sst [smem:[#allocation12_spill]] %s3628_s0 }
   0x2   :  { %3651 = sst [smem:[#allocation13_spill]] %s3629_s1 }
   0x3   :  { %3652 = sst [smem:[#allocation14_spill]] %s3630_s2 }
   0x4   :  { %24 = vsyncpa [#allocation3], 0 }
   0x5   :  { %25 = vsyncpa [#allocation4], 0 }
   0x6   :  { %26 = vsyncpa [#allocation7], 0  ;;  %s2681_s27 = smov [#allocation2]   ;;  %s3653_s0 = sld [smem:[#allocation12_spill]] }
   0x7   :  { %s32_s28 = sshll.u32 %s2681_s27, 4  ;;  %s33_s28 = int_to_ptr.vmem [resolvable:$true] %s32_s28 }
   0xc   :  { %s2587_s19 = scalar_lea.hbm %s3653_s0, 3072 }
   0xd   :  { %p2588_p0 = scmp.ne.s32.totalorder %s3653_s0, %s2587_s19  ;;  %p2591_p1 = scmp.lt.u32.totalorder %s2587_s19, %s3653_s0 }
   0xf   :  { %p2593_p2 = pnand %p2591_p1, %p2588_p0 }
  0x11   :  { %2596 = shalt.err (!%p2593_p2)
}
  0x12   :  { %s2597_s2 = scalar_lea.vmem %s33_s28, 3072  ;;  %p2602_p4 = scmp.lt.s32.totalorder %s33_s28, %s33_s28 }
  0x13   :  { %p2598_p3 = scmp.ne.s32.totalorder %s33_s28, %s2597_s2  ;;  %p2603_p5 = scmp.lt.s32.totalorder %s2597_s2, %s2597_s2 }
  0x15   :  { %p2604_p6 = por %p2603_p5, %p2602_p4 }
  0x17   :  { %p2605_p7 = pnand %p2604_p6, %p2598_p3 }
  0x19   :  { %2608 = shalt.err (!%p2605_p7)
}
  0x1a   :  { %s2682_s23 = smov 1024   ;;  %s2683_s24 = smov 64  }
  0x1b   :  { %38 = dma.hbm_to_vmem [thread:$0]  %s3653_s0, 3072, %s33_s28, [#allocation3], %s2682_s23, %s2682_s23, %s2683_s24  }
  0x1c   :  { %2675 = dma.done.wait [#allocation3], 3072  }
  0x1d   :  { %2676 = vsyncadd [#allocation3], 4294964224  ;;  %v2684_v0 = vmov 0   ;;  %v74_v1 = vld [vmem:[#allocation2 + $0x8] sm:$0xff]  ;;  %v76_v3 = vld [vmem:[#allocation2 + $0x18] sm:$0xff]  ;;  %vm158_vm0 = vcmask 1043456  }
  0x1e   :  { %215 = vmatprep.mubr.bf16.mxu0 %v2684_v0  ;;  %268 = vmatprep.mubr.bf16.mxu1 %v2684_v0  ;;  %v82_v2 = vld [vmem:[#allocation2 + $0x48] sm:$0xff]  ;;  %v84_v5 = vld [vmem:[#allocation2 + $0x58] sm:$0xff]  ;;  %v73_v6 = vld [vmem:[#allocation2] sm:$0xff]  ;;  %s3654_s29 = sld [smem:[#allocation14_spill]]  ;;  %vm151_vm1 = vcmask 195584  }
  0x1f   :  { %2496 = vset.pattern.permute.xlu0 %v2684_v0  ;;  %2497 = vset.pattern.permute.xlu1 %v2684_v0  ;;  %v106_v4 = vpack.c.bf16 %v82_v2, %v74_v1  ;;  %v81_v7 = vld [vmem:[#allocation2 + $0x40] sm:$0xff]  ;;  %v108_v8 = vpack.c.bf16 %v84_v5, %v76_v3  ;;  %v75_v10 = vld [vmem:[#allocation2 + $0x10] sm:$0xff]  ;;  %v90_v12 = vld [vmem:[#allocation2 + $0x88] sm:$0xff] }
  0x20   :  { %v105_v9 = vpack.c.bf16 %v81_v7, %v73_v6  ;;  %v83_v11 = vld [vmem:[#allocation2 + $0x50] sm:$0xff]  ;;  %v114_v14 = vpack.c.bf16 %v90_v12, %v90_v12  ;;  %v92_v15 = vld [vmem:[#allocation2 + $0x98] sm:$0xff]  ;;  %v89_v16 = vld [vmem:[#allocation2 + $0x80] sm:$0xff] }
  0x21   :  { %183 = vmatprep.subr.bf16.mxu0 %v106_v4  ;;  %v107_v13 = vpack.c.bf16 %v83_v11, %v75_v10  ;;  %v91_v17 = vld [vmem:[#allocation2 + $0x90] sm:$0xff]  ;;  %236 = vmatprep.subr.bf16.mxu1 %v108_v8  ;;  %v116_v18 = vpack.c.bf16 %v92_v15, %v92_v15  ;;  %v113_v19 = vpack.c.bf16 %v89_v16, %v89_v16  ;;  %v78_v22 = vld [vmem:[#allocation2 + $0x28] sm:$0xff]  ;;  %v80_v24 = vld [vmem:[#allocation2 + $0x38] sm:$0xff] }
  0x22   :  { %184 = vmatpush1.bf16.msra.mxu0 %v105_v9  ;;  %v115_v20 = vpack.c.bf16 %v91_v17, %v91_v17  ;;  %v86_v23 = vld [vmem:[#allocation2 + $0x68] sm:$0xff]  ;;  %v88_v28 = vld [vmem:[#allocation2 + $0x78] sm:$0xff]  ;;  %v77_v29 = vld [vmem:[#allocation2 + $0x20] sm:$0xff] }
  0x23   :  { %237 = vmatpush1.bf16.msra.mxu1 %v107_v13  ;;  %2433 = vmatprep.subr.msk.bf16.mxu0 %vm158_vm0, %v114_v14  ;;  %v160_v25 = vsel %vm158_vm0, %v113_v19, 0  ;;  %v110_v27 = vpack.c.bf16 %v86_v23, %v78_v22  ;;  %v85_v30 = vld [vmem:[#allocation2 + $0x60] sm:$0xff]  ;;  %v112_v31 = vpack.c.bf16 %v88_v28, %v80_v24  ;;  %v79_v32 = vld [vmem:[#allocation2 + $0x30] sm:$0xff]  ;;  %v94_v35 = vld [vmem:[#allocation2 + $0xa8] sm:$0xff] }
  0x24   :  { %v2807_v21 = vld [vmem:[%s3654_s29] sm:$0xff]   ;;  %2436 = vmatprep.subr.msk.bf16.mxu1 %vm158_vm0, %v116_v18  ;;  %v166_v26 = vsel %vm158_vm0, %v115_v20, 0  ;;  %v87_v33 = vld [vmem:[#allocation2 + $0x70] sm:$0xff]  ;;  %v109_v34 = vpack.c.bf16 %v85_v30, %v77_v29  ;;  %v96_v37 = vld [vmem:[#allocation2 + $0xb8] sm:$0xff]  ;;  %v118_v40 = vpack.c.bf16 %v94_v35, %v94_v35 }
  0x25   :  { %v111_v36 = vpack.c.bf16 %v87_v33, %v79_v32  ;;  %v93_v38 = vld [vmem:[#allocation2 + $0xa0] sm:$0xff]  ;;  %v95_v39 = vld [vmem:[#allocation2 + $0xb0] sm:$0xff]  ;;  %v120_v44 = vpack.c.bf16 %v96_v37, %v96_v37  ;;  %v102_v45 = vld [vmem:[%s3631_s3 + $0x8] sm:$0xff] }
  0x26   :  { %186 = vmatpush1.bf16.msra.mxu0 %v160_v25  ;;  %v117_v41 = vpack.c.bf16 %v93_v38, %v93_v38  ;;  %v119_v42 = vpack.c.bf16 %v95_v39, %v95_v39  ;;  %v101_v43 = vld [vmem:[%s3631_s3] sm:$0xff]  ;;  %v103_v47 = vld [vmem:[%s3631_s3 + $0x10] sm:$0xff]  ;;  %v2499_v49 = vld [vmem:[%s3654_s29 + $0x8] sm:$0xff]   ;;  %s3655_s29 = sld [smem:[#allocation13_spill]] }
  0x27   :  { %239 = vmatpush1.bf16.msra.mxu1 %v166_v26  ;;  %289 = vmatprep.subr.bf16.mxu0 %v110_v27  ;;  %v495_v50 = vld [vmem:[%s3633_s5] sm:$0xff]  ;;  %v104_v51 = vld [vmem:[%s3631_s3 + $0x18] sm:$0xff]  ;;  %v497_v52 = vld [vmem:[%s3633_s5 + $0x10] sm:$0xff] }
  0x28   :  { %342 = vmatprep.subr.bf16.mxu1 %v112_v31  ;;  %123 = vperm.xlu0 %2496, %v101_v43   ;;  %v172_v46 = vsel %vm158_vm0, %v117_v41, 0  ;;  %v178_v48 = vsel %vm158_vm0, %v119_v42, 0  ;;  %v496_v53 = vld [vmem:[%s3633_s5 + $0x8] sm:$0xff]  ;;  %v864_v54 = vld [vmem:[%s3635_s7] sm:$0xff]  ;;  %v498_v55 = vld [vmem:[%s3633_s5 + $0x18] sm:$0xff] }
  0x29   :  { %2434 = vmatmul.mubr.msk.bf16.vlgmr.msra.gmra.mrb[0].mxu0 %vm151_vm1, %v2807_v21  ;;  %133 = vperm.xlu1 %2497, %v103_v47   ;;  %v866_v56 = vld [vmem:[%s3635_s7 + $0x10] sm:$0xff]  ;;  %v865_v57 = vld [vmem:[%s3635_s7 + $0x8] sm:$0xff]  ;;  %v1652_v58 = vld [vmem:[%s3639_s11] sm:$0xff] }
  0x2a   :  { %2437 = vmatmul.mubr.msk.bf16.vlgmr.msra.gmra.mrb[0].mxu1 %vm151_vm1, %v2807_v21  ;;  %290 = vmatpush1.bf16.msra.mxu0 %v109_v34  ;;  %v867_v59 = vld [vmem:[%s3635_s7 + $0x18] sm:$0xff]  ;;  %v1928_v60 = vld [vmem:[%s3641_s13] sm:$0xff]  ;;  %v1653_v61 = vld [vmem:[%s3639_s11 + $0x8] sm:$0xff] }
  0x2b   :  { %343 = vmatpush1.bf16.msra.mxu1 %v111_v36  ;;  %225 = vmatprep.mubr.bf16.mxu0 %v2684_v0  ;;  %v1230_v62 = vld [vmem:[%s3637_s9] sm:$0xff]  ;;  %v1929_v63 = vld [vmem:[%s3641_s13 + $0x8] sm:$0xff]  ;;  %s2687_s13 = smov [#allocation5]  }
  0x2c   :  { %278 = vmatprep.mubr.bf16.mxu1 %v2684_v0  ;;  %2439 = vmatprep.subr.msk.bf16.mxu0 %vm158_vm0, %v118_v40  ;;  %v2178_v1 = vld [vmem:[%s3643_s15] sm:$0xf]  ;;  %v1231_v2 = vld [vmem:[%s3637_s9 + $0x8] sm:$0x1f]  ;;  %s2393_s15 = sshll.u32 %s2687_s13, 4  ;;  %s2394_s15 = int_to_ptr.vmem [resolvable:$true] %s2393_s15 }
  0x2d   :  { %2442 = vmatprep.subr.msk.bf16.mxu1 %vm158_vm0, %v120_v44  ;;  %128 = vperm.xlu0 %2496, %v102_v45  }
  0x2e   :  { %292 = vmatpush1.bf16.msra.mxu0 %v172_v46  ;;  %138 = vperm.xlu1 %2497, %v104_v51  }
  0x2f   :  { %345 = vmatpush1.bf16.msra.mxu1 %v178_v48 }
  0x31   :  { %2435 = vmatmul.mubr.msk.bf16.gmra.mrb[4].mxu0 %vm151_vm1, %v2499_v49  ;;  %517 = vperm.xlu0 %2496, %v495_v50  }
  0x32   :  { %2438 = vmatmul.mubr.msk.bf16.gmra.mrb[4].mxu1 %vm151_vm1, %v2499_v49  ;;  %321 = vmatprep.mubr.bf16.mxu0 %v2684_v0 }
  0x33   :  { %374 = vmatprep.mubr.bf16.mxu1 %v2684_v0  ;;  %522 = vperm.xlu1 %2497, %v496_v53  }
  0x35   :  { %527 = vperm.xlu0 %2496, %v497_v52  }
  0x37   :  { %532 = vperm.xlu1 %2497, %v498_v55  }
  0x39   :  { %2440 = vmatmul.mubr.msk.bf16.vlgmr.msra.gmra.mrb[8].mxu0 %vm151_vm1, %v2807_v21  ;;  %886 = vperm.xlu0 %2496, %v864_v54  }
  0x3a   :  { %2443 = vmatmul.mubr.msk.bf16.vlgmr.msra.gmra.mrb[8].mxu1 %vm151_vm1, %v2807_v21  ;;  %331 = vmatprep.mubr.bf16.mxu0 %v2684_v0 }
  0x3b   :  { %384 = vmatprep.mubr.bf16.mxu1 %v2684_v0  ;;  %891 = vperm.xlu1 %2497, %v865_v57  }
  0x3d   :  { %896 = vperm.xlu0 %2496, %v866_v56  }
  0x3f   :  { %901 = vperm.xlu1 %2497, %v867_v59  }
  0x41   :  { %2441 = vmatmul.mubr.msk.bf16.gmra.mrb[12].mxu0 %vm151_vm1, %v2499_v49  ;;  %1664 = vperm.xlu0 %2496, %v1652_v58  }
  0x42   :  { %2444 = vmatmul.mubr.msk.bf16.gmra.mrb[12].mxu1 %vm151_vm1, %v2499_v49  ;;  %584 = vmatprep.mubr.bf16.mxu0 %v2684_v0 }
  0x43   :  { %637 = vmatprep.mubr.bf16.mxu1 %v2684_v0  ;;  %1669 = vperm.xlu1 %2497, %v1653_v61  }
  0x45   :  { %1940 = vperm.xlu0 %2496, %v1928_v60  }
  0x47   :  { %1945 = vperm.xlu1 %2497, %v1929_v63  }
  0x49   :  { %1250 = vperm.xlu0 %2496, %v1230_v62  }
  0x4b   :  { %1255 = vperm.xlu1 %2497, %v1231_v2  }
  0x4d   :  { %2189 = vperm.xlu0 %2496, %v2178_v1  }
  0xa7   :  { %v2896_v3 = vpop.permute.xlu0 %123 }
  0xa8   :  { %v2907_v25 = vpop.permute.xlu1 %133 }
  0xac   :  { %v2898_v4 = vpop.permute.xlu0 %128 }
  0xad   :  { %v2920_v50 = vpop.permute.xlu1 %138 }
  0xfc   :  { %v217_v5 = vpop.f32.mrb[0].mxu0 }
  0xfd   :  { %v218_v6 = vadd.f32 %v217_v5, %v2896_v3  ;;  %v270_v7 = vpop.f32.mrb[0].mxu1  ;;  %v219_v8 = vpop.f32.mrb[1].mxu0 }
  0xfe   :  { %v271_v9 = vadd.f32 %v270_v7, %v2896_v3  ;;  %v220_v10 = vadd.f32 %v219_v8, %v2896_v3  ;;  %v272_v11 = vpop.f32.mrb[1].mxu1  ;;  %v221_v12 = vpop.f32.mrb[2].mxu0 }
  0xff   :  { %v427_v13 = vmul.f32 0.01, %v218_v6  ;;  %v273_v14 = vadd.f32 %v272_v11, %v2896_v3  ;;  %v222_v15 = vadd.f32 %v221_v12, %v2898_v4  ;;  %v274_v16 = vpop.f32.mrb[2].mxu1  ;;  %v223_v17 = vpop.f32.mrb[3].mxu0  ;;  %vm395_vm2 = vcmp.gt.f32.partialorder %v218_v6, 0.0 }
 0x100   :  { %v429_v18 = vmul.f32 0.01, %v271_v9  ;;  %vm397_vm3 = vcmp.gt.f32.partialorder %v271_v9, 0.0  ;;  %vm396_vm4 = vcmp.gt.f32.partialorder %v220_v10, 0.0  ;;  %v428_v19 = vmul.f32 0.01, %v220_v10 }
 0x101   :  { %vm403_vm5 = vcmp.gt.f32.partialorder %v222_v15, 0.0  ;;  %v276_v20 = vpop.f32.mrb[3].mxu1  ;;  %v430_v21 = vmul.f32 0.01, %v273_v14  ;;  %v435_v22 = vmul.f32 0.01, %v222_v15  ;;  %v275_v23 = vadd.f32 %v274_v16, %v2898_v4 }
 0x102   :  { %v224_v24 = vadd.f32 %v223_v17, %v2898_v4  ;;  %v459_v26 = vsel %vm395_vm2, %v218_v6, %v427_v13  ;;  %vm398_vm6 = vcmp.gt.f32.partialorder %v273_v14, 0.0  ;;  %v277_v27 = vadd.f32 %v276_v20, %v2898_v4 }
 0x103   :  { %v2910_v28 = vsel %vm397_vm3, %v271_v9, %v429_v18  ;;  %v467_v29 = vsel %vm403_vm5, %v222_v15, %v435_v22  ;;  %vm405_vm7 = vcmp.gt.f32.partialorder %v275_v23, 0.0  ;;  %v437_v30 = vmul.f32 0.01, %v275_v23 }
 0x104   :  { %v227_v31 = vpop.f32.mrb[4].mxu0  ;;  %v499_v32 = vpack.c.bf16 %v467_v29, %v459_v26  ;;  %vm404_vm8 = vcmp.gt.f32.partialorder %v224_v24, 0.0  ;;  %v436_v33 = vmul.f32 0.01, %v224_v24  ;;  %v460_v35 = vsel %vm396_vm4, %v220_v10, %v428_v19 }
 0x105   :  { %v280_v34 = vpop.f32.mrb[4].mxu1  ;;  %v469_v36 = vsel %vm405_vm7, %v275_v23, %v437_v30  ;;  %v228_v37 = vadd.f32 %v227_v31, %v2907_v25  ;;  %v229_v39 = vpop.f32.mrb[5].mxu0  ;;  %v462_v41 = vsel %vm398_vm6, %v273_v14, %v430_v21  ;;  %v438_v43 = vmul.f32 0.01, %v277_v27 }
 0x106   :  { %v281_v38 = vadd.f32 %v280_v34, %v2907_v25  ;;  %v282_v40 = vpop.f32.mrb[5].mxu1  ;;  %v501_v42 = vpack.c.bf16 %v469_v36, %v2910_v28  ;;  %v230_v44 = vadd.f32 %v229_v39, %v2907_v25  ;;  %v231_v46 = vpop.f32.mrb[6].mxu0  ;;  %vm406_vm9 = vcmp.gt.f32.partialorder %v277_v27, 0.0 }
 0x107   :  { %v283_v45 = vadd.f32 %v282_v40, %v2907_v25  ;;  %v284_v47 = vpop.f32.mrb[6].mxu1  ;;  %vm411_vm10 = vcmp.gt.f32.partialorder %v228_v37, 0.0  ;;  %v443_v48 = vmul.f32 0.01, %v228_v37  ;;  %v468_v49 = vsel %vm404_vm8, %v224_v24, %v436_v33  ;;  %v233_v56 = vpop.f32.mrb[7].mxu0 }
 0x108   :  { %vm413_vm11 = vcmp.gt.f32.partialorder %v281_v38, 0.0  ;;  %v445_v51 = vmul.f32 0.01, %v281_v38  ;;  %vm412_vm12 = vcmp.gt.f32.partialorder %v230_v44, 0.0  ;;  %v444_v52 = vmul.f32 0.01, %v230_v44 }
 0x109   :  { %vm414_vm13 = vcmp.gt.f32.partialorder %v283_v45, 0.0  ;;  %v446_v53 = vmul.f32 0.01, %v283_v45  ;;  %v232_v54 = vadd.f32 %v231_v46, %v2920_v50  ;;  %v285_v55 = vadd.f32 %v284_v47, %v2920_v50  ;;  %v286_v57 = vpop.f32.mrb[7].mxu1 }
 0x10a   :  { %v234_v58 = vadd.f32 %v233_v56, %v2920_v50  ;;  %v287_v59 = vadd.f32 %v286_v57, %v2920_v50  ;;  %v500_v60 = vpack.c.bf16 %v468_v49, %v460_v35  ;;  %v470_v61 = vsel %vm406_vm9, %v277_v27, %v438_v43 }
 0x10b   :  { %vm419_vm14 = vcmp.gt.f32.partialorder %v232_v54, 0.0  ;;  %v451_v62 = vmul.f32 0.01, %v232_v54  ;;  %vm421_vm15 = vcmp.gt.f32.partialorder %v285_v55, 0.0  ;;  %v453_v63 = vmul.f32 0.01, %v285_v55 }
 0x10c   :  { %v475_v1 = vsel %vm411_vm10, %v228_v37, %v443_v48  ;;  %v2929_v2 = vsel %vm413_vm11, %v281_v38, %v445_v51  ;;  %vm420_vm0 = vcmp.gt.f32.partialorder %v234_v58, 0.0  ;;  %v452_v5 = vmul.f32 0.01, %v234_v58  ;;  %552 = vmatprep.subr.bf16.mxu0 %v500_v60  ;;  %v323_v9 = vpop.f32.mrb[8].mxu0 }
 0x10d   :  { %v483_v6 = vsel %vm419_vm14, %v232_v54, %v451_v62  ;;  %v2931_v7 = vsel %vm421_vm15, %v285_v55, %v453_v63  ;;  %vm422_vm1 = vcmp.gt.f32.partialorder %v287_v59, 0.0  ;;  %v502_v8 = vpack.c.bf16 %v470_v61, %v462_v41  ;;  %553 = vmatpush1.bf16.msra.mxu0 %v499_v32  ;;  %v376_v10 = vpop.f32.mrb[8].mxu1  ;;  %v325_v15 = vpop.f32.mrb[9].mxu0 }
 0x10e   :  { %v507_v11 = vpack.c.bf16 %v483_v6, %v475_v1  ;;  %v509_v12 = vpack.c.bf16 %v2931_v7, %v2929_v2  ;;  %v324_v13 = vadd.f32 %v323_v9, %v2896_v3  ;;  %v377_v14 = vadd.f32 %v376_v10, %v2896_v3  ;;  %v378_v16 = vpop.f32.mrb[9].mxu1  ;;  %v327_v20 = vpop.f32.mrb[10].mxu0 }
 0x10f   :  { %vm545_vm2 = vcmask 261120   ;;  %v454_v17 = vmul.f32 0.01, %v287_v59  ;;  %605 = vmatprep.subr.bf16.mxu1 %v502_v8  ;;  %v2938_v18 = vadd.f32 %v325_v15, %v2896_v3  ;;  %v2941_v19 = vadd.f32 %v378_v16, %v2896_v3  ;;  %v380_v21 = vpop.f32.mrb[10].mxu1  ;;  %v329_v32 = vpop.f32.mrb[11].mxu0 }
 0x110   :  { %v476_v22 = vsel %vm412_vm12, %v230_v44, %v444_v52  ;;  %606 = vmatpush1.bf16.msra.mxu1 %v501_v42  ;;  %vm399_vm3 = vcmp.gt.f32.partialorder %v324_v13, 0.0  ;;  %v431_v23 = vmul.f32 0.01, %v324_v13  ;;  %v484_v24 = vsel %vm420_vm0, %v234_v58, %v452_v5  ;;  %v382_v33 = vpop.f32.mrb[11].mxu1 }
 0x111   :  { %v478_v26 = vsel %vm414_vm13, %v283_v45, %v446_v53  ;;  %vm401_vm4 = vcmp.gt.f32.partialorder %v377_v14, 0.0  ;;  %v433_v27 = vmul.f32 0.01, %v377_v14  ;;  %vm400_vm5 = vcmp.gt.f32.partialorder %v2938_v18, 0.0 }
 0x112   :  { %v2948_v28 = vmul.f32 0.01, %v2938_v18  ;;  %v2950_v3 = vsel %vm399_vm3, %v324_v13, %v431_v23  ;;  %v2953_v29 = vmul.f32 0.01, %v2941_v19  ;;  %v328_v30 = vadd.f32 %v327_v20, %v2898_v4 }
 0x113   :  { %v381_v31 = vadd.f32 %v380_v21, %v2898_v4  ;;  %v330_v34 = vadd.f32 %v329_v32, %v2898_v4  ;;  %v2959_v35 = vadd.f32 %v382_v33, %v2898_v4  ;;  %v508_v36 = vpack.c.bf16 %v484_v24, %v476_v22  ;;  %v2970_v4 = vld [vmem:[%s3632_s4] sm:$0xff]   ;;  %v3032_v33 = vpop.permute.xlu1 %522 }
 0x114   :  { %v486_v37 = vsel %vm422_vm1, %v287_v59, %v454_v17  ;;  %v333_v38 = vpop.f32.mrb[12].mxu0  ;;  %vm402_vm6 = vcmp.gt.f32.partialorder %v2941_v19, 0.0  ;;  %vm407_vm7 = vcmp.gt.f32.partialorder %v328_v30, 0.0  ;;  %v439_v39 = vmul.f32 0.01, %v328_v30 }
 0x115   :  { %vm409_vm8 = vcmp.gt.f32.partialorder %v381_v31, 0.0  ;;  %v441_v40 = vmul.f32 0.01, %v381_v31  ;;  %v2964_v41 = vsel %vm401_vm4, %v377_v14, %v433_v27  ;;  %vm408_vm9 = vcmp.gt.f32.partialorder %v330_v34, 0.0  ;;  %554 = vmatprep.subr.bf16.mxu0 %v508_v36  ;;  %v386_v47 = vpop.f32.mrb[12].mxu1  ;;  %v335_v48 = vpop.f32.mrb[13].mxu0 }
 0x116   :  { %v440_v42 = vmul.f32 0.01, %v330_v34  ;;  %vm410_vm10 = vcmp.gt.f32.partialorder %v2959_v35, 0.0  ;;  %v2972_v43 = vsel %vm407_vm7, %v328_v30, %v439_v39  ;;  %v510_v45 = vpack.c.bf16 %v486_v37, %v478_v26  ;;  %555 = vmatpush1.bf16.msra.mxu0 %v507_v11  ;;  %v388_v54 = vpop.f32.mrb[13].mxu1  ;;  %v337_v55 = vpop.f32.mrb[14].mxu0  ;;  %v2501_v14 = vld [vmem:[%s3632_s4 + $0x8] sm:$0xff]  }
 0x117   :  { %v2974_v44 = vsel %vm409_vm8, %v381_v31, %v441_v40  ;;  %v334_v46 = vadd.f32 %v333_v38, %v2907_v25  ;;  %v503_v49 = vpack.c.bf16 %v2972_v43, %v2950_v3  ;;  %v387_v52 = vadd.f32 %v386_v47, %v2907_v25  ;;  %v390_v59 = vpop.f32.mrb[14].mxu1  ;;  %v339_v60 = vpop.f32.mrb[15].mxu0 }
 0x118   :  { %v505_v51 = vpack.c.bf16 %v2974_v44, %v2964_v41  ;;  %v336_v53 = vadd.f32 %v335_v48, %v2907_v25  ;;  %607 = vmatprep.subr.bf16.mxu1 %v510_v45  ;;  %v389_v57 = vadd.f32 %v388_v54, %v2907_v25  ;;  %v338_v58 = vadd.f32 %v337_v55, %v2920_v50  ;;  %v392_v25 = vpop.f32.mrb[15].mxu1 }
 0x119   :  { %vm415_vm11 = vcmp.gt.f32.partialorder %v334_v46, 0.0  ;;  %v447_v56 = vmul.f32 0.01, %v334_v46  ;;  %v442_v61 = vmul.f32 0.01, %v2959_v35  ;;  %608 = vmatpush1.bf16.msra.mxu1 %v509_v12  ;;  %2447 = vmatmul.mubr.msk.bf16.vlgmr.msra.gmra.mrb[16].mxu0 %vm545_vm2, %v2970_v4  ;;  %vm417_vm12 = vcmp.gt.f32.partialorder %v387_v52, 0.0 }
 0x11a   :  { %v449_v62 = vmul.f32 0.01, %v387_v52  ;;  %vm416_vm13 = vcmp.gt.f32.partialorder %v336_v53, 0.0  ;;  %v448_v1 = vmul.f32 0.01, %v336_v53  ;;  %vm418_vm14 = vcmp.gt.f32.partialorder %v389_v57, 0.0  ;;  %594 = vmatprep.mubr.bf16.mxu0 %v2684_v0 }
 0x11b   :  { %v479_v63 = vsel %vm415_vm11, %v334_v46, %v447_v56  ;;  %vm423_vm15 = vcmp.gt.f32.partialorder %v338_v58, 0.0  ;;  %v450_v5 = vmul.f32 0.01, %v389_v57  ;;  %v455_v6 = vmul.f32 0.01, %v338_v58 }
 0x11c   :  { %v391_v8 = vadd.f32 %v390_v59, %v2920_v50  ;;  %v340_v2 = vadd.f32 %v339_v60, %v2920_v50  ;;  %2449 = vmatmul.mubr.msk.bf16.vlgmr.msra.gmra.mrb[16].mxu1 %vm545_vm2, %v2970_v4  ;;  %v481_v7 = vsel %vm417_vm12, %v387_v52, %v449_v62  ;;  %v393_v9 = vadd.f32 %v392_v25, %v2920_v50 }
 0x11d   :  { %v464_v10 = vsel %vm400_vm5, %v2938_v18, %v2948_v28  ;;  %v472_v11 = vsel %vm408_vm9, %v330_v34, %v440_v42  ;;  %v487_v12 = vsel %vm423_vm15, %v338_v58, %v455_v6  ;;  %647 = vmatprep.mubr.bf16.mxu1 %v2684_v0  ;;  %v466_v18 = vsel %vm402_vm6, %v2941_v19, %v2953_v29  ;;  %v3029_v19 = vpop.permute.xlu0 %517 }
 0x11e   :  { %vm425_vm0 = vcmp.gt.f32.partialorder %v391_v8, 0.0  ;;  %v457_v13 = vmul.f32 0.01, %v391_v8  ;;  %vm424_vm1 = vcmp.gt.f32.partialorder %v340_v2, 0.0  ;;  %v511_v15 = vpack.c.bf16 %v487_v12, %v479_v63 }
 0x11f   :  { %v456_v16 = vmul.f32 0.01, %v340_v2  ;;  %vm426_vm3 = vcmp.gt.f32.partialorder %v393_v9, 0.0  ;;  %v458_v50 = vmul.f32 0.01, %v393_v9  ;;  %v504_v20 = vpack.c.bf16 %v472_v11, %v464_v10  ;;  %v3049_v10 = vpop.permute.xlu1 %532 }
 0x120   :  { %v489_v17 = vsel %vm425_vm0, %v391_v8, %v457_v13  ;;  %v474_v21 = vsel %vm410_vm10, %v2959_v35, %v442_v61  ;;  %v480_v24 = vsel %vm416_vm13, %v336_v53, %v448_v1  ;;  %v482_v28 = vsel %vm418_vm14, %v389_v57, %v450_v5 }
 0x121   :  { %v513_v22 = vpack.c.bf16 %v489_v17, %v481_v7  ;;  %v506_v23 = vpack.c.bf16 %v474_v21, %v466_v18  ;;  %v488_v26 = vsel %vm424_vm1, %v340_v2, %v456_v16  ;;  %658 = vmatprep.subr.bf16.mxu0 %v504_v20  ;;  %2448 = vmatmul.mubr.msk.bf16.gmra.mrb[20].mxu0 %vm545_vm2, %v2501_v14  ;;  %v3040_v53 = vpop.permute.xlu0 %527 }
 0x122   :  { %v512_v27 = vpack.c.bf16 %v488_v26, %v480_v24  ;;  %v490_v3 = vsel %vm426_vm3, %v393_v9, %v458_v50  ;;  %659 = vmatpush1.bf16.msra.mxu0 %v503_v49  ;;  %690 = vmatprep.mubr.bf16.mxu0 %v2684_v0 }
 0x123   :  { %711 = vmatprep.subr.bf16.mxu1 %v506_v23  ;;  %v514_v30 = vpack.c.bf16 %v490_v3, %v482_v28 }
 0x124   :  { %712 = vmatpush1.bf16.msra.mxu1 %v505_v51  ;;  %660 = vmatprep.subr.bf16.mxu0 %v512_v27 }
 0x125   :  { %2450 = vmatmul.mubr.msk.bf16.gmra.mrb[20].mxu1 %vm545_vm2, %v2501_v14  ;;  %713 = vmatprep.subr.bf16.mxu1 %v514_v30 }
 0x126   :  { %743 = vmatprep.mubr.bf16.mxu1 %v2684_v0  ;;  %661 = vmatpush1.bf16.msra.mxu0 %v511_v15 }
 0x128   :  { %714 = vmatpush1.bf16.msra.mxu1 %v513_v22 }
 0x129   :  { %2451 = vmatmul.mubr.msk.bf16.vlgmr.msra.gmra.mrb[24].mxu0 %vm545_vm2, %v2970_v4 }
 0x12a   :  { %700 = vmatprep.mubr.bf16.mxu0 %v2684_v0 }
 0x12d   :  { %2453 = vmatmul.mubr.msk.bf16.vlgmr.msra.gmra.mrb[24].mxu1 %vm545_vm2, %v2970_v4 }
 0x12e   :  { %753 = vmatprep.mubr.bf16.mxu1 %v2684_v0 }
 0x131   :  { %2452 = vmatmul.mubr.msk.bf16.gmra.mrb[28].mxu0 %vm545_vm2, %v2501_v14 }
 0x132   :  { %952 = vmatprep.mubr.bf16.mxu0 %v2684_v0 }
 0x135   :  { %2454 = vmatmul.mubr.msk.bf16.gmra.mrb[28].mxu1 %vm545_vm2, %v2501_v14 }
 0x136   :  { %1005 = vmatprep.mubr.bf16.mxu1 %v2684_v0 }
 0x1ec   :  { %v586_v29 = vpop.f32.mrb[16].mxu0 }
 0x1ed   :  { %v587_v31 = vadd.f32 %v586_v29, %v3029_v19  ;;  %v588_v32 = vpop.f32.mrb[17].mxu0 }
 0x1ee   :  { %v589_v34 = vadd.f32 %v588_v32, %v3029_v19  ;;  %v590_v35 = vpop.f32.mrb[18].mxu0 }
 0x1ef   :  { %v796_v36 = vmul.f32 0.01, %v587_v31  ;;  %v639_v37 = vpop.f32.mrb[16].mxu1  ;;  %v591_v38 = vadd.f32 %v590_v35, %v3032_v33  ;;  %v592_v39 = vpop.f32.mrb[19].mxu0  ;;  %vm764_vm4 = vcmp.gt.f32.partialorder %v587_v31, 0.0 }
 0x1f0   :  { %v640_v40 = vadd.f32 %v639_v37, %v3029_v19  ;;  %v641_v41 = vpop.f32.mrb[17].mxu1  ;;  %v593_v42 = vadd.f32 %v592_v39, %v3032_v33  ;;  %v797_v4 = vmul.f32 0.01, %v589_v34  ;;  %vm765_vm6 = vcmp.gt.f32.partialorder %v589_v34, 0.0 }
 0x1f1   :  { %v642_v43 = vadd.f32 %v641_v41, %v3029_v19  ;;  %vm772_vm5 = vcmp.gt.f32.partialorder %v591_v38, 0.0  ;;  %v804_v44 = vmul.f32 0.01, %v591_v38  ;;  %v643_v45 = vpop.f32.mrb[18].mxu1  ;;  %v828_v49 = vsel %vm764_vm4, %v587_v31, %v796_v36 }
 0x1f2   :  { %v798_v46 = vmul.f32 0.01, %v640_v40  ;;  %v644_v47 = vadd.f32 %v643_v45, %v3032_v33  ;;  %vm773_vm7 = vcmp.gt.f32.partialorder %v593_v42, 0.0  ;;  %v645_v48 = vpop.f32.mrb[19].mxu1  ;;  %vm766_vm8 = vcmp.gt.f32.partialorder %v640_v40, 0.0 }
 0x1f3   :  { %v836_v51 = vsel %vm772_vm5, %v591_v38, %v804_v44  ;;  %v805_v52 = vmul.f32 0.01, %v593_v42  ;;  %v799_v54 = vmul.f32 0.01, %v642_v43  ;;  %v646_v58 = vadd.f32 %v645_v48, %v3032_v33 }
 0x1f4   :  { %v868_v55 = vpack.c.bf16 %v836_v51, %v828_v49  ;;  %vm774_vm9 = vcmp.gt.f32.partialorder %v644_v47, 0.0  ;;  %v806_v56 = vmul.f32 0.01, %v644_v47  ;;  %v596_v57 = vpop.f32.mrb[20].mxu0  ;;  %v829_v61 = vsel %vm765_vm6, %v589_v34, %v797_v4 }
 0x1f5   :  { %v597_v59 = vadd.f32 %v596_v57, %v3040_v53  ;;  %v598_v60 = vpop.f32.mrb[21].mxu0  ;;  %v837_v62 = vsel %vm773_vm7, %v593_v42, %v805_v52  ;;  %v830_v63 = vsel %vm766_vm8, %v640_v40, %v798_v46  ;;  %vm767_vm10 = vcmp.gt.f32.partialorder %v642_v43, 0.0 }
 0x1f6   :  { %v838_v1 = vsel %vm774_vm9, %v644_v47, %v806_v56  ;;  %v600_v25 = vpop.f32.mrb[22].mxu0  ;;  %v869_v5 = vpack.c.bf16 %v837_v62, %v829_v61  ;;  %vm775_vm11 = vcmp.gt.f32.partialorder %v646_v58, 0.0  ;;  %v807_v8 = vmul.f32 0.01, %v646_v58 }
 0x1f7   :  { %v870_v6 = vpack.c.bf16 %v838_v1, %v830_v63  ;;  %v3047_v7 = vadd.f32 %v598_v60, %v3040_v53  ;;  %v602_v9 = vpop.f32.mrb[23].mxu0  ;;  %vm780_vm12 = vcmp.gt.f32.partialorder %v597_v59, 0.0  ;;  %v812_v11 = vmul.f32 0.01, %v597_v59 }
 0x1f8   :  { %v649_v2 = vpop.f32.mrb[20].mxu1  ;;  %920 = vmatprep.subr.bf16.mxu0 %v869_v5  ;;  %v601_v15 = vadd.f32 %v600_v25, %v3049_v10  ;;  %v3057_v50 = vadd.f32 %v602_v9, %v3049_v10  ;;  %v831_v17 = vsel %vm767_vm10, %v642_v43, %v799_v54  ;;  %v839_v22 = vsel %vm775_vm11, %v646_v58, %v807_v8 }
 0x1f9   :  { %v650_v12 = vadd.f32 %v649_v2, %v3040_v53  ;;  %v651_v13 = vpop.f32.mrb[21].mxu1  ;;  %921 = vmatpush1.bf16.msra.mxu0 %v868_v55  ;;  %v3063_v23 = vsel %vm780_vm12, %v597_v59, %v812_v11  ;;  %vm781_vm14 = vcmp.gt.f32.partialorder %v3047_v7, 0.0  ;;  %v813_v24 = vmul.f32 0.01, %v3047_v7 }
 0x1fa   :  { %v3053_v14 = vadd.f32 %v651_v13, %v3040_v53  ;;  %v653_v16 = vpop.f32.mrb[22].mxu1  ;;  %vm788_vm15 = vcmp.gt.f32.partialorder %v601_v15, 0.0  ;;  %v820_v26 = vmul.f32 0.01, %v601_v15  ;;  %vm789_vm3 = vcmp.gt.f32.partialorder %v3057_v50, 0.0 }
 0x1fb   :  { %vm782_vm13 = vcmp.gt.f32.partialorder %v650_v12, 0.0  ;;  %v814_v20 = vmul.f32 0.01, %v650_v12  ;;  %v654_v18 = vadd.f32 %v653_v16, %v3049_v10  ;;  %v655_v21 = vpop.f32.mrb[23].mxu1  ;;  %v871_v32 = vpack.c.bf16 %v839_v22, %v831_v17  ;;  %v3126_v22 = vld [vmem:[%s3634_s6] sm:$0xff]  }
 0x1fc   :  { %vm783_vm0 = vcmp.gt.f32.partialorder %v3053_v14, 0.0  ;;  %v815_v28 = vmul.f32 0.01, %v3053_v14  ;;  %v692_v30 = vpop.f32.mrb[24].mxu0  ;;  %v3071_v29 = vsel %vm788_vm15, %v601_v15, %v820_v26  ;;  %v656_v31 = vadd.f32 %v655_v21, %v3049_v10 }
 0x1fd   :  { %v3067_v27 = vsel %vm782_vm13, %v650_v12, %v814_v20  ;;  %vm790_vm1 = vcmp.gt.f32.partialorder %v654_v18, 0.0  ;;  %v822_v3 = vmul.f32 0.01, %v654_v18  ;;  %v694_v34 = vpop.f32.mrb[25].mxu0  ;;  %v876_v35 = vpack.c.bf16 %v3071_v29, %v3063_v23  ;;  %973 = vmatprep.subr.bf16.mxu1 %v871_v32 }
 0x1fe   :  { %v693_v37 = vadd.f32 %v692_v30, %v3029_v19  ;;  %v3081_v38 = vadd.f32 %v694_v34, %v3029_v19  ;;  %v696_v39 = vpop.f32.mrb[26].mxu0  ;;  %v821_v41 = vmul.f32 0.01, %v3057_v50  ;;  %vm791_vm4 = vcmp.gt.f32.partialorder %v656_v31, 0.0  ;;  %974 = vmatpush1.bf16.msra.mxu1 %v870_v6 }
 0x1ff   :  { %v3077_v36 = vsel %vm790_vm1, %v654_v18, %v822_v3  ;;  %v697_v4 = vadd.f32 %v696_v39, %v3032_v33  ;;  %v698_v43 = vpop.f32.mrb[27].mxu0  ;;  %v823_v44 = vmul.f32 0.01, %v656_v31  ;;  %v845_v8 = vsel %vm781_vm14, %v3047_v7, %v813_v24 }
 0x200   :  { %v878_v40 = vpack.c.bf16 %v3077_v36, %v3067_v27  ;;  %v745_v42 = vpop.f32.mrb[24].mxu1  ;;  %vm768_vm5 = vcmp.gt.f32.partialorder %v693_v37, 0.0  ;;  %v800_v45 = vmul.f32 0.01, %v693_v37  ;;  %vm769_vm6 = vcmp.gt.f32.partialorder %v3081_v38, 0.0 }
 0x201   :  { %v746_v46 = vadd.f32 %v745_v42, %v3029_v19  ;;  %v747_v47 = vpop.f32.mrb[25].mxu1  ;;  %vm776_vm7 = vcmp.gt.f32.partialorder %v697_v4, 0.0  ;;  %v808_v49 = vmul.f32 0.01, %v697_v4  ;;  %v801_v54 = vmul.f32 0.01, %v3081_v38 }
 0x202   :  { %v3090_v48 = vadd.f32 %v747_v47, %v3029_v19  ;;  %v749_v51 = vpop.f32.mrb[26].mxu1  ;;  %v3094_v57 = vsel %vm768_vm5, %v693_v37, %v800_v45  ;;  %v699_v59 = vadd.f32 %v698_v43, %v3032_v33  ;;  %v853_v2 = vsel %vm789_vm3, %v3057_v50, %v821_v41 }
 0x203   :  { %vm770_vm8 = vcmp.gt.f32.partialorder %v746_v46, 0.0  ;;  %v802_v52 = vmul.f32 0.01, %v746_v46  ;;  %v750_v55 = vadd.f32 %v749_v51, %v3032_v33  ;;  %v751_v56 = vpop.f32.mrb[27].mxu1  ;;  %v3097_v58 = vsel %vm776_vm7, %v697_v4, %v808_v49 }
 0x204   :  { %vm771_vm9 = vcmp.gt.f32.partialorder %v3090_v48, 0.0  ;;  %v803_v19 = vmul.f32 0.01, %v3090_v48  ;;  %v872_v60 = vpack.c.bf16 %v3097_v58, %v3094_v57  ;;  %v702_v62 = vpop.f32.mrb[28].mxu0  ;;  %vm777_vm11 = vcmp.gt.f32.partialorder %v699_v59, 0.0  ;;  %v3183_v57 = vpop.permute.xlu1 %891 }
 0x205   :  { %vm778_vm10 = vcmp.gt.f32.partialorder %v750_v55, 0.0  ;;  %v810_v61 = vmul.f32 0.01, %v750_v55  ;;  %v3103_v63 = vsel %vm770_vm8, %v746_v46, %v802_v52  ;;  %v809_v1 = vmul.f32 0.01, %v699_v59  ;;  %v704_v5 = vpop.f32.mrb[29].mxu0 }
 0x206   :  { %v752_v25 = vadd.f32 %v751_v56, %v3032_v33  ;;  %v855_v9 = vsel %vm791_vm4, %v656_v31, %v823_v44  ;;  %v706_v11 = vpop.f32.mrb[30].mxu0  ;;  %v877_v13 = vpack.c.bf16 %v853_v2, %v845_v8  ;;  %v847_v33 = vsel %vm783_vm0, %v3053_v14, %v815_v28  ;;  %v2503_v46 = vld [vmem:[%s3634_s6 + $0x8] sm:$0xff]   ;;  %v3181_v56 = vpop.permute.xlu0 %886 }
 0x207   :  { %v3106_v6 = vsel %vm778_vm10, %v750_v55, %v810_v61  ;;  %v708_v16 = vpop.f32.mrb[31].mxu0  ;;  %v879_v17 = vpack.c.bf16 %v855_v9, %v847_v33  ;;  %v703_v7 = vadd.f32 %v702_v62, %v3040_v53  ;;  %v705_v50 = vadd.f32 %v704_v5, %v3040_v53 }
 0x208   :  { %v874_v12 = vpack.c.bf16 %v3106_v6, %v3103_v63  ;;  %vm779_vm12 = vcmp.gt.f32.partialorder %v752_v25, 0.0  ;;  %v755_v15 = vpop.f32.mrb[28].mxu1  ;;  %v811_v21 = vmul.f32 0.01, %v752_v25  ;;  %922 = vmatprep.subr.bf16.mxu0 %v877_v13  ;;  %v707_v14 = vadd.f32 %v706_v11, %v3049_v10 }
 0x209   :  { %v756_v20 = vadd.f32 %v755_v15, %v3040_v53  ;;  %v757_v18 = vpop.f32.mrb[29].mxu1  ;;  %v709_v28 = vadd.f32 %v708_v16, %v3049_v10  ;;  %975 = vmatprep.subr.bf16.mxu1 %v879_v17  ;;  %923 = vmatpush1.bf16.msra.mxu0 %v876_v35  ;;  %vm784_vm13 = vcmp.gt.f32.partialorder %v703_v7, 0.0  ;;  %v816_v3 = vmul.f32 0.01, %v703_v7 }
 0x20a   :  { %v758_v24 = vadd.f32 %v757_v18, %v3040_v53  ;;  %v759_v26 = vpop.f32.mrb[30].mxu1  ;;  %v833_v30 = vsel %vm769_vm6, %v3081_v38, %v801_v54  ;;  %976 = vmatpush1.bf16.msra.mxu1 %v878_v40  ;;  %vm785_vm15 = vcmp.gt.f32.partialorder %v705_v50, 0.0  ;;  %v817_v31 = vmul.f32 0.01, %v705_v50 }
 0x20b   :  { %vm786_vm14 = vcmp.gt.f32.partialorder %v756_v20, 0.0  ;;  %v818_v53 = vmul.f32 0.01, %v756_v20  ;;  %v848_v32 = vsel %vm784_vm13, %v703_v7, %v816_v3  ;;  %vm792_vm1 = vcmp.gt.f32.partialorder %v707_v14, 0.0  ;;  %v761_v29 = vpop.f32.mrb[31].mxu1 }
 0x20c   :  { %vm787_vm0 = vcmp.gt.f32.partialorder %v758_v24, 0.0  ;;  %v819_v34 = vmul.f32 0.01, %v758_v24  ;;  %v824_v23 = vmul.f32 0.01, %v707_v14  ;;  %2457 = vmatmul.mubr.msk.bf16.vlgmr.msra.gmra.mrb[32].mxu0 %vm545_vm2, %v3126_v22  ;;  %v760_v35 = vadd.f32 %v759_v26, %v3049_v10 }
 0x20d   :  { %vm793_vm3 = vcmp.gt.f32.partialorder %v709_v28, 0.0  ;;  %v825_v37 = vmul.f32 0.01, %v709_v28  ;;  %v762_v38 = vadd.f32 %v761_v29, %v3049_v10  ;;  %2459 = vmatmul.mubr.msk.bf16.vlgmr.msra.gmra.mrb[32].mxu1 %vm545_vm2, %v3126_v22  ;;  %v841_v36 = vsel %vm777_vm11, %v699_v59, %v809_v1  ;;  %962 = vmatprep.mubr.bf16.mxu0 %v2684_v0 }
 0x20e   :  { %v856_v27 = vsel %vm792_vm1, %v707_v14, %v824_v23  ;;  %v835_v39 = vsel %vm771_vm9, %v3090_v48, %v803_v19  ;;  %v843_v40 = vsel %vm779_vm12, %v752_v25, %v811_v21  ;;  %vm794_vm4 = vcmp.gt.f32.partialorder %v760_v35, 0.0  ;;  %1015 = vmatprep.mubr.bf16.mxu1 %v2684_v0 }
 0x20f   :  { %v880_v41 = vpack.c.bf16 %v856_v27, %v848_v32  ;;  %v826_v42 = vmul.f32 0.01, %v760_v35  ;;  %vm795_vm5 = vcmp.gt.f32.partialorder %v762_v38, 0.0  ;;  %v850_v10 = vsel %vm786_vm14, %v756_v20, %v818_v53 }
 0x210   :  { %v827_v4 = vmul.f32 0.01, %v762_v38  ;;  %v873_v43 = vpack.c.bf16 %v841_v36, %v833_v30  ;;  %v875_v44 = vpack.c.bf16 %v843_v40, %v835_v39  ;;  %v849_v47 = vsel %vm785_vm15, %v705_v50, %v817_v31  ;;  %v3205_v40 = vpop.permute.xlu1 %901 }
 0x211   :  { %v858_v45 = vsel %vm794_vm4, %v760_v35, %v826_v42  ;;  %v857_v48 = vsel %vm793_vm3, %v709_v28, %v825_v37  ;;  %v851_v49 = vsel %vm787_vm0, %v758_v24, %v819_v34 }
 0x212   :  { %v882_v51 = vpack.c.bf16 %v858_v45, %v850_v10  ;;  %1026 = vmatprep.subr.bf16.mxu0 %v873_v43  ;;  %1079 = vmatprep.subr.bf16.mxu1 %v875_v44  ;;  %v881_v52 = vpack.c.bf16 %v857_v48, %v849_v47  ;;  %v859_v54 = vsel %vm795_vm5, %v762_v38, %v827_v4 }
 0x213   :  { %1027 = vmatpush1.bf16.msra.mxu0 %v872_v60  ;;  %1080 = vmatpush1.bf16.msra.mxu1 %v874_v12  ;;  %v883_v55 = vpack.c.bf16 %v859_v54, %v851_v49 }
 0x214   :  { %1028 = vmatprep.subr.bf16.mxu0 %v881_v52  ;;  %2458 = vmatmul.mubr.msk.bf16.gmra.mrb[36].mxu0 %vm545_vm2, %v2503_v46 }
 0x215   :  { %1081 = vmatprep.subr.bf16.mxu1 %v883_v55  ;;  %2460 = vmatmul.mubr.msk.bf16.gmra.mrb[36].mxu1 %vm545_vm2, %v2503_v46 }
 0x216   :  { %1058 = vmatprep.mubr.bf16.mxu0 %v2684_v0  ;;  %1111 = vmatprep.mubr.bf16.mxu1 %v2684_v0 }
 0x217   :  { %1029 = vmatpush1.bf16.msra.mxu0 %v880_v41  ;;  %1082 = vmatpush1.bf16.msra.mxu1 %v882_v51 }
 0x21c   :  { %2461 = vmatmul.mubr.msk.bf16.vlgmr.msra.gmra.mrb[40].mxu0 %vm545_vm2, %v3126_v22 }
 0x21d   :  { %2463 = vmatmul.mubr.msk.bf16.vlgmr.msra.gmra.mrb[40].mxu1 %vm545_vm2, %v3126_v22  ;;  %1068 = vmatprep.mubr.bf16.mxu0 %v2684_v0  ;;  %v3195_v22 = vpop.permute.xlu0 %896 }
 0x21e   :  { %1121 = vmatprep.mubr.bf16.mxu1 %v2684_v0 }
 0x224   :  { %2462 = vmatmul.mubr.msk.bf16.gmra.mrb[44].mxu0 %vm545_vm2, %v2503_v46 }
 0x225   :  { %2464 = vmatmul.mubr.msk.bf16.gmra.mrb[44].mxu1 %vm545_vm2, %v2503_v46  ;;  %1298 = vmatprep.mubr.bf16.mxu0 %v2684_v0 }
 0x226   :  { %1341 = vmatprep.mubr.bf16.mxu1 %v2684_v0 }
 0x2df   :  { %v954_v58 = vpop.f32.mrb[32].mxu0 }
 0x2e0   :  { %v955_v59 = vadd.f32 %v954_v58, %v3181_v56  ;;  %v1007_v19 = vpop.f32.mrb[32].mxu1  ;;  %v956_v60 = vpop.f32.mrb[33].mxu0 }
 0x2e1   :  { %v1008_v61 = vadd.f32 %v1007_v19, %v3181_v56  ;;  %v957_v62 = vadd.f32 %v956_v60, %v3181_v56  ;;  %v1009_v63 = vpop.f32.mrb[33].mxu1  ;;  %v958_v1 = vpop.f32.mrb[34].mxu0 }
 0x2e2   :  { %v1164_v25 = vmul.f32 0.01, %v955_v59  ;;  %v1010_v5 = vadd.f32 %v1009_v63, %v3181_v56  ;;  %v959_v6 = vadd.f32 %v958_v1, %v3183_v57  ;;  %v1011_v8 = vpop.f32.mrb[34].mxu1  ;;  %v960_v2 = vpop.f32.mrb[35].mxu0  ;;  %vm1132_vm6 = vcmp.gt.f32.partialorder %v955_v59, 0.0 }
 0x2e3   :  { %v1166_v9 = vmul.f32 0.01, %v1008_v61  ;;  %vm1134_vm7 = vcmp.gt.f32.partialorder %v1008_v61, 0.0  ;;  %vm1133_vm8 = vcmp.gt.f32.partialorder %v957_v62, 0.0  ;;  %v1165_v11 = vmul.f32 0.01, %v957_v62 }
 0x2e4   :  { %vm1140_vm9 = vcmp.gt.f32.partialorder %v959_v6, 0.0  ;;  %v1013_v12 = vpop.f32.mrb[35].mxu1  ;;  %v1167_v13 = vmul.f32 0.01, %v1010_v5  ;;  %v1172_v33 = vmul.f32 0.01, %v959_v6  ;;  %v1012_v15 = vadd.f32 %v1011_v8, %v3183_v57 }
 0x2e5   :  { %v961_v16 = vadd.f32 %v960_v2, %v3183_v57  ;;  %v1196_v17 = vsel %vm1132_vm6, %v955_v59, %v1164_v25  ;;  %vm1135_vm10 = vcmp.gt.f32.partialorder %v1010_v5, 0.0  ;;  %v1014_v7 = vadd.f32 %v1013_v12, %v3183_v57 }
 0x2e6   :  { %v3193_v20 = vsel %vm1134_vm7, %v1008_v61, %v1166_v9  ;;  %v1204_v50 = vsel %vm1140_vm9, %v959_v6, %v1172_v33  ;;  %vm1142_vm11 = vcmp.gt.f32.partialorder %v1012_v15, 0.0  ;;  %v1174_v18 = vmul.f32 0.01, %v1012_v15 }
 0x2e7   :  { %v964_v21 = vpop.f32.mrb[36].mxu0  ;;  %v1232_v24 = vpack.c.bf16 %v1204_v50, %v1196_v17  ;;  %vm1141_vm12 = vcmp.gt.f32.partialorder %v961_v16, 0.0  ;;  %v1173_v14 = vmul.f32 0.01, %v961_v16  ;;  %v1197_v28 = vsel %vm1133_vm8, %v957_v62, %v1165_v11 }
 0x2e8   :  { %v1017_v26 = vpop.f32.mrb[36].mxu1  ;;  %v1206_v3 = vsel %vm1142_vm11, %v1012_v15, %v1174_v18  ;;  %v965_v30 = vadd.f32 %v964_v21, %v3195_v22  ;;  %v966_v31 = vpop.f32.mrb[37].mxu0  ;;  %v1199_v34 = vsel %vm1135_vm10, %v1010_v5, %v1167_v13  ;;  %v1175_v29 = vmul.f32 0.01, %v1014_v7 }
 0x2e9   :  { %v1018_v53 = vadd.f32 %v1017_v26, %v3195_v22  ;;  %v1019_v32 = vpop.f32.mrb[37].mxu1  ;;  %v1234_v23 = vpack.c.bf16 %v1206_v3, %v3193_v20  ;;  %v967_v35 = vadd.f32 %v966_v31, %v3195_v22  ;;  %v968_v38 = vpop.f32.mrb[38].mxu0  ;;  %vm1143_vm13 = vcmp.gt.f32.partialorder %v1014_v7, 0.0 }
 0x2ea   :  { %v1020_v37 = vadd.f32 %v1019_v32, %v3195_v22  ;;  %v1021_v27 = vpop.f32.mrb[38].mxu1  ;;  %vm1148_vm14 = vcmp.gt.f32.partialorder %v965_v30, 0.0  ;;  %v1180_v36 = vmul.f32 0.01, %v965_v30  ;;  %v1205_v39 = vsel %vm1141_vm12, %v961_v16, %v1173_v14  ;;  %v970_v44 = vpop.f32.mrb[39].mxu0 }
 0x2eb   :  { %vm1150_vm15 = vcmp.gt.f32.partialorder %v1018_v53, 0.0  ;;  %v1182_v41 = vmul.f32 0.01, %v1018_v53  ;;  %vm1149_vm0 = vcmp.gt.f32.partialorder %v967_v35, 0.0  ;;  %v1181_v42 = vmul.f32 0.01, %v967_v35 }
 0x2ec   :  { %vm1151_vm1 = vcmp.gt.f32.partialorder %v1020_v37, 0.0  ;;  %v1183_v10 = vmul.f32 0.01, %v1020_v37  ;;  %v969_v4 = vadd.f32 %v968_v38, %v3205_v40  ;;  %v1022_v43 = vadd.f32 %v1021_v27, %v3205_v40  ;;  %v1023_v45 = vpop.f32.mrb[39].mxu1 }
 0x2ed   :  { %v971_v46 = vadd.f32 %v970_v44, %v3205_v40  ;;  %v1024_v47 = vadd.f32 %v1023_v45, %v3205_v40  ;;  %v1233_v48 = vpack.c.bf16 %v1205_v39, %v1197_v28  ;;  %v1207_v49 = vsel %vm1143_vm13, %v1014_v7, %v1175_v29 }
 0x2ee   :  { %vm1156_vm3 = vcmp.gt.f32.partialorder %v969_v4, 0.0  ;;  %v1188_v51 = vmul.f32 0.01, %v969_v4  ;;  %vm1158_vm4 = vcmp.gt.f32.partialorder %v1022_v43, 0.0  ;;  %v1190_v52 = vmul.f32 0.01, %v1022_v43 }
 0x2ef   :  { %v1212_v54 = vsel %vm1148_vm14, %v965_v30, %v1180_v36  ;;  %v3214_v55 = vsel %vm1150_vm15, %v1018_v53, %v1182_v41  ;;  %vm1157_vm5 = vcmp.gt.f32.partialorder %v971_v46, 0.0  ;;  %v1189_v58 = vmul.f32 0.01, %v971_v46  ;;  %1266 = vmatprep.subr.bf16.mxu0 %v1233_v48  ;;  %v1060_v61 = vpop.f32.mrb[40].mxu0 }
 0x2f0   :  { %v1220_v59 = vsel %vm1156_vm3, %v969_v4, %v1188_v51  ;;  %v3216_v19 = vsel %vm1158_vm4, %v1022_v43, %v1190_v52  ;;  %vm1159_vm6 = vcmp.gt.f32.partialorder %v1024_v47, 0.0  ;;  %v1235_v60 = vpack.c.bf16 %v1207_v49, %v1199_v34  ;;  %1267 = vmatpush1.bf16.msra.mxu0 %v1232_v24  ;;  %v1113_v62 = vpop.f32.mrb[40].mxu1  ;;  %v1062_v6 = vpop.f32.mrb[41].mxu0 }
 0x2f1   :  { %v1240_v63 = vpack.c.bf16 %v1220_v59, %v1212_v54  ;;  %v1242_v1 = vpack.c.bf16 %v3216_v19, %v3214_v55  ;;  %v1061_v25 = vadd.f32 %v1060_v61, %v3181_v56  ;;  %v1114_v5 = vadd.f32 %v1113_v62, %v3181_v56  ;;  %v1115_v8 = vpop.f32.mrb[41].mxu1  ;;  %v1064_v12 = vpop.f32.mrb[42].mxu0 }
 0x2f2   :  { %v1191_v2 = vmul.f32 0.01, %v1024_v47  ;;  %1309 = vmatprep.subr.bf16.mxu1 %v1235_v60  ;;  %v3223_v9 = vadd.f32 %v1062_v6, %v3181_v56  ;;  %v3226_v11 = vadd.f32 %v1115_v8, %v3181_v56  ;;  %v1117_v13 = vpop.f32.mrb[42].mxu1  ;;  %v1213_v33 = vsel %vm1149_vm0, %v967_v35, %v1181_v42  ;;  %v1066_v24 = vpop.f32.mrb[43].mxu0 }
 0x2f3   :  { %1310 = vmatpush1.bf16.msra.mxu1 %v1234_v23  ;;  %vm1136_vm7 = vcmp.gt.f32.partialorder %v1061_v25, 0.0  ;;  %v1168_v15 = vmul.f32 0.01, %v1061_v25  ;;  %v1221_v16 = vsel %vm1157_vm5, %v971_v46, %v1189_v58  ;;  %v1215_v17 = vsel %vm1151_vm1, %v1020_v37, %v1183_v10  ;;  %v1119_v14 = vpop.f32.mrb[43].mxu1 }
 0x2f4   :  { %vm1138_vm8 = vcmp.gt.f32.partialorder %v1114_v5, 0.0  ;;  %v1170_v7 = vmul.f32 0.01, %v1114_v5  ;;  %vm1137_vm9 = vcmp.gt.f32.partialorder %v3223_v9, 0.0  ;;  %v3233_v20 = vmul.f32 0.01, %v3223_v9 }
 0x2f5   :  { %v3235_v56 = vsel %vm1136_vm7, %v1061_v25, %v1168_v15  ;;  %v3238_v50 = vmul.f32 0.01, %v3226_v11  ;;  %v1065_v18 = vadd.f32 %v1064_v12, %v3183_v57  ;;  %v1118_v21 = vadd.f32 %v1117_v13, %v3183_v57  ;;  %v1635_v13 = vld [vmem:[%s3655_s29 + $0x8] sm:$0xff] }
 0x2f6   :  { %v1067_v26 = vadd.f32 %v1066_v24, %v3183_v57  ;;  %v3244_v28 = vadd.f32 %v1119_v14, %v3183_v57  ;;  %v1241_v3 = vpack.c.bf16 %v1221_v16, %v1213_v33  ;;  %v1223_v30 = vsel %vm1159_vm6, %v1024_v47, %v1191_v2  ;;  %v3255_v57 = vld [vmem:[%s3636_s8] sm:$0x7f]   ;;  %v1643_v33 = vld [vmem:[%s3655_s29 + $0x48] sm:$0xf]  ;;  %v1645_v14 = vld [vmem:[%s3655_s29 + $0x58] sm:$0xf] }
 0x2f7   :  { %v1070_v53 = vpop.f32.mrb[44].mxu0  ;;  %vm1139_vm10 = vcmp.gt.f32.partialorder %v3226_v11, 0.0  ;;  %vm1144_vm11 = vcmp.gt.f32.partialorder %v1065_v18, 0.0  ;;  %v1176_v31 = vmul.f32 0.01, %v1065_v18  ;;  %vm1146_vm12 = vcmp.gt.f32.partialorder %v1118_v21, 0.0 }
 0x2f8   :  { %v1178_v32 = vmul.f32 0.01, %v1118_v21  ;;  %v3249_v34 = vsel %vm1138_vm8, %v1114_v5, %v1170_v7  ;;  %vm1145_vm13 = vcmp.gt.f32.partialorder %v1067_v26, 0.0  ;;  %v1177_v23 = vmul.f32 0.01, %v1067_v26  ;;  %1268 = vmatprep.subr.bf16.mxu0 %v1241_v3  ;;  %v1123_v27 = vpop.f32.mrb[44].mxu1 }
 0x2f9   :  { %vm1147_vm14 = vcmp.gt.f32.partialorder %v3244_v28, 0.0  ;;  %v3257_v29 = vsel %vm1144_vm11, %v1065_v18, %v1176_v31  ;;  %v1243_v37 = vpack.c.bf16 %v1223_v30, %v1215_v17  ;;  %1269 = vmatpush1.bf16.msra.mxu0 %v1240_v63  ;;  %v1071_v38 = vadd.f32 %v1070_v53, %v3195_v22  ;;  %v1072_v36 = vpop.f32.mrb[45].mxu0  ;;  %v1125_v4 = vpop.f32.mrb[45].mxu1 }
 0x2fa   :  { %v3259_v35 = vsel %vm1146_vm12, %v1118_v21, %v1178_v32  ;;  %v1236_v39 = vpack.c.bf16 %v3257_v29, %v3235_v56  ;;  %v1124_v42 = vadd.f32 %v1123_v27, %v3195_v22  ;;  %v1073_v10 = vadd.f32 %v1072_v36, %v3195_v22  ;;  %v1074_v43 = vpop.f32.mrb[46].mxu0  ;;  %v1127_v47 = vpop.f32.mrb[46].mxu1  ;;  %v1647_v56 = vld [vmem:[%s3655_s29 + $0x68] sm:$0xf]  ;;  %v1649_v29 = vld [vmem:[%s3655_s29 + $0x78] sm:$0xf] }
 0x2fb   :  { %v1238_v41 = vpack.c.bf16 %v3259_v35, %v3249_v34  ;;  %1311 = vmatprep.subr.bf16.mxu1 %v1243_v37  ;;  %vm1152_vm15 = vcmp.gt.f32.partialorder %v1071_v38, 0.0  ;;  %v1184_v44 = vmul.f32 0.01, %v1071_v38  ;;  %v1126_v45 = vadd.f32 %v1125_v4, %v3195_v22  ;;  %v1076_v48 = vpop.f32.mrb[47].mxu0  ;;  %v1129_v22 = vpop.f32.mrb[47].mxu1  ;;  %v1641_v34 = vld [vmem:[%s3655_s29 + $0x38] sm:$0xff] }
 0x2fc   :  { %v1075_v46 = vadd.f32 %v1074_v43, %v3205_v40  ;;  %v1179_v49 = vmul.f32 0.01, %v3244_v28  ;;  %1312 = vmatpush1.bf16.msra.mxu1 %v1242_v1  ;;  %2466 = vmatmul.mubr.msk.bf16.vlgmr.msra.gmra.mrb[48].mxu0 %vm545_vm2, %v3255_v57  ;;  %vm1154_vm0 = vcmp.gt.f32.partialorder %v1124_v42, 0.0  ;;  %v1186_v51 = vmul.f32 0.01, %v1124_v42  ;;  %v1638_v27 = vld [vmem:[%s3655_s29 + $0x20] sm:$0xff] }
 0x2fd   :  { %vm1153_vm1 = vcmp.gt.f32.partialorder %v1073_v10, 0.0  ;;  %v1216_v52 = vsel %vm1152_vm15, %v1071_v38, %v1184_v44  ;;  %v1185_v54 = vmul.f32 0.01, %v1073_v10  ;;  %vm1155_vm3 = vcmp.gt.f32.partialorder %v1126_v45, 0.0  ;;  %1384 = vmatprep.mubr.bf16.mxu0 %v2684_v0  ;;  %v1646_v36 = vld [vmem:[%s3655_s29 + $0x60] sm:$0xf] }
 0x2fe   :  { %vm1160_vm4 = vcmp.gt.f32.partialorder %v1075_v46, 0.0  ;;  %v1187_v58 = vmul.f32 0.01, %v1126_v45  ;;  %v1192_v59 = vmul.f32 0.01, %v1075_v46  ;;  %v1128_v60 = vadd.f32 %v1127_v47, %v3205_v40  ;;  %v2505_v43 = vld [vmem:[%s3638_s10] sm:$0xff]  }
 0x2ff   :  { %v1077_v55 = vadd.f32 %v1076_v48, %v3205_v40  ;;  %2467 = vmatmul.mubr.msk.bf16.vlgmr.msra.gmra.mrb[48].mxu1 %vm545_vm2, %v3255_v57  ;;  %v1218_v19 = vsel %vm1154_vm0, %v1124_v42, %v1186_v51  ;;  %v1130_v61 = vadd.f32 %v1129_v22, %v3205_v40  ;;  %v1201_v62 = vsel %vm1137_vm9, %v3223_v9, %v3233_v20  ;;  %v1634_v20 = vld [vmem:[%s3655_s29] sm:$0xff]  ;;  %v1648_v42 = vld [vmem:[%s3655_s29 + $0x70] sm:$0xf] }
 0x300   :  { %v1209_v63 = vsel %vm1145_vm13, %v1067_v26, %v1177_v23  ;;  %v1224_v1 = vsel %vm1160_vm4, %v1075_v46, %v1192_v59  ;;  %vm1162_vm5 = vcmp.gt.f32.partialorder %v1128_v60, 0.0  ;;  %v1194_v25 = vmul.f32 0.01, %v1128_v60  ;;  %1427 = vmatprep.mubr.bf16.mxu1 %v2684_v0  ;;  %v1636_v26 = vld [vmem:[%s3655_s29 + $0x10] sm:$0xff]  ;;  %v1639_v23 = vld [vmem:[%s3655_s29 + $0x28] sm:$0xff]  ;;  %v3375_v46 = vpop.permute.xlu1 %1669 }
 0x301   :  { %vm1161_vm6 = vcmp.gt.f32.partialorder %v1077_v55, 0.0  ;;  %v1244_v5 = vpack.c.bf16 %v1224_v1, %v1216_v52  ;;  %v1193_v6 = vmul.f32 0.01, %v1077_v55  ;;  %vm1163_vm7 = vcmp.gt.f32.partialorder %v1130_v61, 0.0 }
 0x302   :  { %v1195_v8 = vmul.f32 0.01, %v1130_v61  ;;  %v1226_v2 = vsel %vm1162_vm5, %v1128_v60, %v1194_v25  ;;  %v1237_v12 = vpack.c.bf16 %v1209_v63, %v1201_v62  ;;  %v1203_v40 = vsel %vm1139_vm10, %v3226_v11, %v3238_v50  ;;  %v1637_v11 = vld [vmem:[%s3655_s29 + $0x18] sm:$0xff]  ;;  %v1642_v50 = vld [vmem:[%s3655_s29 + $0x40] sm:$0xf] }
 0x303   :  { %v1211_v9 = vsel %vm1147_vm14, %v3244_v28, %v1179_v49  ;;  %v1246_v15 = vpack.c.bf16 %v1226_v2, %v1218_v19  ;;  %v1217_v17 = vsel %vm1153_vm1, %v1073_v10, %v1185_v54  ;;  %v1225_v7 = vsel %vm1161_vm6, %v1077_v55, %v1193_v6  ;;  %v1644_v28 = vld [vmem:[%s3655_s29 + $0x50] sm:$0xf] }
 0x304   :  { %v1239_v16 = vpack.c.bf16 %v1211_v9, %v1203_v40  ;;  %1352 = vmatprep.subr.bf16.mxu0 %v1237_v12  ;;  %v1245_v18 = vpack.c.bf16 %v1225_v7, %v1217_v17  ;;  %v1219_v21 = vsel %vm1155_vm3, %v1126_v45, %v1187_v58  ;;  %v1227_v24 = vsel %vm1163_vm7, %v1130_v61, %v1195_v8  ;;  %v3373_v45 = vpop.permute.xlu0 %1664  ;;  %v3379_v48 = vpop.permute.xlu1 %1945 }
 0x305   :  { %1353 = vmatpush1.bf16.msra.mxu0 %v1236_v39  ;;  %v1247_v3 = vpack.c.bf16 %v1227_v24, %v1219_v21  ;;  %v1655_v30 = vpack.c.bf16 %v1643_v33, %v1635_v13  ;;  %v1654_v53 = vpack.c.bf16 %v1642_v50, %v1634_v20  ;;  %vm1681_vm8 = vcmask 1045504  }
 0x306   :  { %1395 = vmatprep.subr.bf16.mxu1 %v1239_v16  ;;  %1354 = vmatprep.subr.bf16.mxu0 %v1245_v18  ;;  %v1657_v31 = vpack.c.bf16 %v1645_v14, %v1637_v11  ;;  %v1656_v32 = vpack.c.bf16 %v1644_v28, %v1636_v26  ;;  %v1659_v38 = vpack.c.bf16 %v1647_v56, %v1639_v23  ;;  %vm1677_vm9 = vcmask 97280  }
 0x307   :  { %1396 = vmatpush1.bf16.msra.mxu1 %v1238_v41  ;;  %v1683_v35 = vsel %vm1681_vm8, %v1654_v53, 0  ;;  %v1661_v39 = vpack.c.bf16 %v1649_v29, %v1641_v34  ;;  %v1640_v41 = vld [vmem:[%s3655_s29 + $0x30] sm:$0xff]  ;;  %v1658_v10 = vpack.c.bf16 %v1646_v36, %v1638_v27  ;;  %v2685_v7 = vmov 1966171168  }
 0x308   :  { %1397 = vmatprep.subr.bf16.mxu1 %v1247_v3  ;;  %v1689_v37 = vsel %vm1681_vm8, %v1656_v32, 0  ;;  %v1660_v4 = vpack.c.bf16 %v1648_v42, %v1640_v41  ;;  %v3377_v47 = vpop.permute.xlu0 %1940  ;;  %v3384_v22 = vpop.permute.xlu1 %1255  ;;  %v3393_v11 = vunpack.c.l.s4 %v2685_v7  ;;  %v1501_v26 = vlaneseq }
 0x309   :  { %1355 = vmatpush1.bf16.msra.mxu0 %v1244_v5  ;;  %v1695_v44 = vsel %vm1681_vm8, %v1658_v10, 0 }
 0x30a   :  { %2471 = vmatprep.subr.msk.bf16.mxu0 %vm1681_vm8, %v1655_v30 }
 0x30b   :  { %1398 = vmatpush1.bf16.msra.mxu1 %v1246_v15 }
 0x30c   :  { %2473 = vmatprep.subr.msk.bf16.mxu1 %vm1681_vm8, %v1657_v31  ;;  %2468 = vmatmul.mubr.msk.bf16.vlgmr.msra.gmra.mrb[52].mxu0 %vm545_vm2, %v3255_v57  ;;  %v3381_v49 = vpop.permute.xlu0 %1250  ;;  %v1500_v31 = vunpack.c.0.s8 %v3393_v11 }
 0x30d   :  { %1707 = vmatpush1.bf16.msra.mxu0 %v1683_v35  ;;  %1738 = vmatprep.mubr.bf16.mxu0 %v2684_v0 }
 0x30e   :  { %2469 = vmatmul.mubr.msk.bf16.vlgmr.msra.gmra.mrb[52].mxu1 %vm545_vm2, %v3255_v57  ;;  %2475 = vmatprep.subr.msk.bf16.mxu0 %vm1681_vm8, %v1659_v38  ;;  %v1701_v57 = vsel %vm1681_vm8, %v1660_v4, 0  ;;  %vm1577_vm2 = vcmask 1046528  }
 0x30f   :  { %1750 = vmatpush1.bf16.msra.mxu1 %v1689_v37  ;;  %1781 = vmatprep.mubr.bf16.mxu1 %v2684_v0 }
 0x310   :  { %2477 = vmatprep.subr.msk.bf16.mxu1 %vm1681_vm8, %v1661_v39 }
 0x314   :  { %2472 = vmatmul.mubr.msk.bf16.vlgmr.msra.gmra.mrb[56].mxu0 %vm1677_vm9, %v2505_v43 }
 0x315   :  { %1793 = vmatpush1.bf16.msra.mxu0 %v1695_v44  ;;  %1824 = vmatprep.mubr.bf16.mxu0 %v2684_v0 }
 0x316   :  { %2474 = vmatmul.mubr.msk.bf16.vlgmr.msra.gmra.mrb[56].mxu1 %vm1677_vm9, %v2505_v43 }
 0x317   :  { %1836 = vmatpush1.bf16.msra.mxu1 %v1701_v57  ;;  %1867 = vmatprep.mubr.bf16.mxu1 %v2684_v0  ;;  %v1502_v57 = vshrl.u32 %v1501_v26, 7 }
 0x31c   :  { %2476 = vmatmul.mubr.msk.bf16.vlgmr.msra.gmra.mrb[60].mxu0 %vm1677_vm9, %v2505_v43 }
 0x31d   :  { %1989 = vmatprep.mubr.bf16.mxu0 %v2684_v0 }
 0x31e   :  { %2478 = vmatmul.mubr.msk.bf16.vlgmr.msra.gmra.mrb[60].mxu1 %vm1677_vm9, %v2505_v43 }
 0x31f   :  { %2032 = vmatprep.mubr.bf16.mxu1 %v2684_v0 }
 0x3cf   :  { %v1300_v51 = vpop.f32.mrb[48].mxu0 }
 0x3d0   :  { %v1301_v52 = vadd.f32 %v1300_v51, %v3381_v49  ;;  %v1302_v54 = vpop.f32.mrb[49].mxu0 }
 0x3d1   :  { %v1303_v58 = vadd.f32 %v1302_v54, %v3381_v49  ;;  %v1304_v59 = vpop.f32.mrb[50].mxu0 }
 0x3d2   :  { %v1438_v60 = vsub.f32 5.0, %v1301_v52  ;;  %2507 = vtanh.f32 %v1301_v52  ;;  %v1343_v55 = vpop.f32.mrb[48].mxu1  ;;  %v1305_v19 = vadd.f32 %v1304_v59, %v3384_v22  ;;  %v1306_v61 = vpop.f32.mrb[51].mxu0 }
 0x3d3   :  { %v1344_v62 = vadd.f32 %v1343_v55, %v3381_v49  ;;  %v1439_v63 = vsub.f32 5.0, %v1303_v58  ;;  %2509 = vtanh.f32 %v1303_v58  ;;  %v1345_v1 = vpop.f32.mrb[49].mxu1  ;;  %v1307_v15 = vadd.f32 %v1306_v61, %v3384_v22 }
 0x3d4   :  { %v1446_v25 = vmul.f32 1.442695, %v1438_v60  ;;  %v1346_v5 = vadd.f32 %v1345_v1, %v3381_v49  ;;  %2511 = vtanh.f32 %v1305_v19  ;;  %v1347_v6 = vpop.f32.mrb[50].mxu1 }
 0x3d5   :  { %v1440_v8 = vsub.f32 5.0, %v1344_v62  ;;  %2513 = vtanh.f32 %v1344_v62  ;;  %v1448_v2 = vmul.f32 1.442695, %v1439_v63  ;;  %v1349_v12 = vpop.f32.mrb[51].mxu1  ;;  %v1348_v13 = vadd.f32 %v1347_v6, %v3384_v22 }
 0x3d6   :  { %2515 = vpow2.f32 %v1446_v25  ;;  %v1441_v40 = vsub.f32 5.0, %v1346_v5  ;;  %v1350_v16 = vadd.f32 %v1349_v12, %v3384_v22 }
 0x3d7   :  { %v1450_v9 = vmul.f32 1.442695, %v1440_v8  ;;  %2517 = vpow2.f32 %v1448_v2 }
 0x3d8   :  { %v1452_v33 = vmul.f32 1.442695, %v1441_v40  ;;  %2519 = vtanh.f32 %v1346_v5 }
 0x3d9   :  { %2521 = vpow2.f32 %v1450_v9 }
 0x3da   :  { %2523 = vpow2.f32 %v1452_v33 }
 0x3db   :  { %2525 = vtanh.f32 %v1348_v13 }
 0x3dc   :  { %v2508_v17 = vpop.eup %2507  ;;  %2527 = vtanh.f32 %v1307_v15 }
 0x3dd   :  { %v3395_v20 = vpop.eup %2509  ;;  %2529 = vtanh.f32 %v1350_v16  ;;  %v1578_v21 = vrot.slane %v2508_v17, 1 }
 0x3de   :  { %v2512_v50 = vpop.eup %2511  ;;  %v1581_v60 = vrot.slane %v3395_v20, 1 }
 0x3df   :  { %v2514_v18 = vpop.eup %2513  ;;  %v1579_v24 = vrot.slane %v2512_v50, 1  ;;  %v1386_v14 = vpop.f32.mrb[52].mxu0 }
 0x3e0   :  { %v2516_v28 = vpop.eup %2515  ;;  %v1387_v3 = vadd.f32 %v1386_v14, %v3381_v49  ;;  %v1388_v53 = vpop.f32.mrb[53].mxu0  ;;  %v1584_v61 = vrot.slane %v2514_v18, 1 }
 0x3e1   :  { %v1429_v30 = vpop.f32.mrb[52].mxu1  ;;  %v2518_v32 = vpop.eup %2517  ;;  %v1462_v23 = vadd.f32 1.0, %v2516_v28  ;;  %v1580_v56 = vsel %vm1577_vm2, %v1578_v21, %v1579_v24  ;;  %1626 = vst [vmem:[#allocation6 + $0x40] sm:$0xf] %v1579_v24  ;;  %v1389_v29 = vadd.f32 %v1388_v53, %v3381_v49 }
 0x3e2   :  { %v1430_v34 = vadd.f32 %v1429_v30, %v3381_v49  ;;  %v1431_v35 = vpop.f32.mrb[53].mxu1  ;;  %v1390_v37 = vpop.f32.mrb[54].mxu0  ;;  %v1463_v27 = vadd.f32 1.0, %v2518_v32  ;;  %1618 = vst [vmem:[#allocation6] sm:$0xff] %v1580_v56  ;;  %v1442_v36 = vsub.f32 5.0, %v1387_v3  ;;  %2531 = vtanh.f32 %v1387_v3 }
 0x3e3   :  { %v2520_v38 = vpop.eup %2519  ;;  %v3403_v39 = vadd.f32 %v1431_v35, %v3381_v49  ;;  %v1433_v41 = vpop.f32.mrb[54].mxu1  ;;  %2533 = vrcp.f32 %v1462_v23  ;;  %v1443_v43 = vsub.f32 5.0, %v1389_v29  ;;  %v1391_v40 = vadd.f32 %v1390_v37, %v3384_v22 }
 0x3e4   :  { %v1392_v42 = vpop.f32.mrb[55].mxu0  ;;  %v2522_v10 = vpop.eup %2521  ;;  %v1444_v4 = vsub.f32 5.0, %v1430_v34  ;;  %2535 = vrcp.f32 %v1463_v27  ;;  %v1454_v54 = vmul.f32 1.442695, %v1442_v36  ;;  %v1587_v25 = vrot.slane %v2520_v38, 1 }
 0x3e5   :  { %v1435_v44 = vpop.f32.mrb[55].mxu1  ;;  %v2524_v51 = vpop.eup %2523  ;;  %v1464_v52 = vadd.f32 1.0, %v2522_v10  ;;  %v1445_v58 = vsub.f32 5.0, %v3403_v39  ;;  %2537 = vtanh.f32 %v1430_v34  ;;  %v1456_v63 = vmul.f32 1.442695, %v1443_v43 }
 0x3e6   :  { %v2526_v59 = vpop.eup %2525  ;;  %v1465_v55 = vadd.f32 1.0, %v2524_v51  ;;  %v1458_v49 = vmul.f32 1.442695, %v1444_v4  ;;  %v1434_v14 = vadd.f32 %v1433_v41, %v3384_v22  ;;  %v1393_v26 = vadd.f32 %v1392_v42, %v3384_v22 }
 0x3e7   :  { %v2528_v19 = vpop.eup %2527  ;;  %2539 = vrcp.f32 %v1464_v52  ;;  %v1585_v62 = vrot.slane %v2526_v59, 1  ;;  %v1460_v6 = vmul.f32 1.442695, %v1445_v58  ;;  %v1740_v8 = vpop.f32.mrb[56].mxu0  ;;  %v3423_v3 = vsub.s32 %v1500_v31, %v1502_v57 }
 0x3e8   :  { %v2530_v1 = vpop.eup %2529  ;;  %2541 = vrcp.f32 %v1465_v55  ;;  %v1582_v5 = vrot.slane %v2528_v19, 1  ;;  %v1742_v13 = vpop.f32.mrb[57].mxu0  ;;  %v1741_v15 = vadd.f32 %v1740_v8, %v3373_v45  ;;  %v1436_v53 = vadd.f32 %v1435_v44, %v3384_v22 }
 0x3e9   :  { %v1586_v2 = vsel %vm1577_vm2, %v1584_v61, %v1585_v62  ;;  %1628 = vst [vmem:[#allocation6 + $0x50] sm:$0xf] %v1585_v62  ;;  %v1588_v12 = vrot.slane %v2530_v1, 1  ;;  %2543 = vpow2.f32 %v1454_v54  ;;  %v1783_v9 = vpop.f32.mrb[56].mxu1  ;;  %v1744_v7 = vpop.f32.mrb[58].mxu0  ;;  %v3414_v50 = vadd.f32 %v1742_v13, %v3373_v45 }
 0x3ea   :  { %1620 = vst [vmem:[#allocation6 + $0x10] sm:$0xff] %v1586_v2  ;;  %v1583_v33 = vsel %vm1577_vm2, %v1581_v60, %v1582_v5  ;;  %1627 = vst [vmem:[#allocation6 + $0x48] sm:$0xf] %v1582_v5  ;;  %2545 = vpow2.f32 %v1458_v49  ;;  %v1784_v16 = vadd.f32 %v1783_v9, %v3373_v45  ;;  %v1785_v17 = vpop.f32.mrb[57].mxu1  ;;  %v1746_v24 = vpop.f32.mrb[59].mxu0  ;;  %vm1878_vm10 = vcmp.gt.f32.partialorder %v1741_v15, 0.0 }
 0x3eb   :  { %1619 = vst [vmem:[#allocation6 + $0x8] sm:$0xff] %v1583_v33  ;;  %v1589_v20 = vsel %vm1577_vm2, %v1587_v25, %v1588_v12  ;;  %1629 = vst [vmem:[#allocation6 + $0x58] sm:$0xf] %v1588_v12  ;;  %2547 = vpow2.f32 %v1456_v63  ;;  %v3417_v18 = vadd.f32 %v1785_v17, %v3373_v45  ;;  %v1787_v21 = vpop.f32.mrb[58].mxu1  ;;  %v1894_v32 = vmul.f32 0.01, %v1741_v15 }
 0x3ec   :  { %1621 = vst [vmem:[#allocation6 + $0x18] sm:$0xff] %v1589_v20  ;;  %2549 = vtanh.f32 %v1389_v29  ;;  %v1789_v28 = vpop.f32.mrb[59].mxu1  ;;  %v3425_v30 = vpop.eup %2531  ;;  %vm1880_vm11 = vcmp.gt.f32.partialorder %v1784_v16, 0.0  ;;  %v1896_v56 = vmul.f32 0.01, %v1784_v16  ;;  %v1745_v22 = vadd.f32 %v1744_v7, %v3375_v46 }
 0x3ed   :  { %2551 = vpow2.f32 %v1460_v6  ;;  %v3428_v23 = vpop.eup %2533  ;;  %v3432_v34 = vmul.f32 0.01, %v3414_v50  ;;  %v1590_v11 = vrot.slane %v3425_v30, 1  ;;  %v3438_v31 = vmul.f32 0.01, %v3417_v18 }
 0x3ee   :  { %2553 = vtanh.f32 %v3403_v39  ;;  %v3434_v29 = vpop.eup %2535  ;;  %v1788_v37 = vadd.f32 %v1787_v21, %v3375_v46  ;;  %v3445_v38 = vadd.f32 %v1746_v24, %v3375_v46  ;;  %v3448_v27 = vadd.f32 %v1789_v28, %v3375_v46 }
 0x3ef   :  { %2555 = vtanh.f32 %v1391_v40  ;;  %v3441_v35 = vpop.eup %2537  ;;  %v1826_v36 = vpop.f32.mrb[60].mxu0  ;;  %v3453_v41 = vsel %vm1878_vm10, %v1741_v15, %v1894_v32  ;;  %vm1886_vm12 = vcmp.gt.f32.partialorder %v1745_v22, 0.0  ;;  %v1902_v42 = vmul.f32 0.01, %v1745_v22 }
 0x3f0   :  { %2557 = vtanh.f32 %v1434_v14  ;;  %v1828_v4 = vpop.f32.mrb[61].mxu0  ;;  %v3458_v44 = vsel %vm1880_vm11, %v1784_v16, %v1896_v56  ;;  %vm1888_vm13 = vcmp.gt.f32.partialorder %v1788_v37, 0.0  ;;  %v1904_v57 = vmul.f32 0.01, %v1788_v37 }
 0x3f1   :  { %v3450_v39 = vpop.eup %2539  ;;  %2559 = vtanh.f32 %v1393_v26  ;;  %v1869_v10 = vpop.f32.mrb[60].mxu1  ;;  %v1596_v58 = vrot.slane %v3441_v35, 1  ;;  %v3461_v59 = vsel %vm1886_vm12, %v1745_v22, %v1902_v42  ;;  %v3464_v60 = vmul.f32 0.01, %v3445_v38 }
 0x3f2   :  { %v3455_v43 = vpop.eup %2541  ;;  %2561 = vtanh.f32 %v1436_v53  ;;  %v1871_v51 = vpop.f32.mrb[61].mxu1  ;;  %v3467_v55 = vmul.f32 0.01, %v3448_v27  ;;  %v1930_v62 = vpack.c.bf16 %v3461_v59, %v3453_v41  ;;  %v3471_v63 = vsel %vm1888_vm13, %v1788_v37, %v1904_v57 }
 0x3f3   :  { %v1830_v52 = vpop.f32.mrb[62].mxu0  ;;  %v2544_v54 = vpop.eup %2543  ;;  %v1827_v1 = vadd.f32 %v1826_v36, %v3373_v45  ;;  %vm1879_vm14 = vcmp.gt.f32.partialorder %v3414_v50, 0.0  ;;  %vm1881_vm15 = vcmp.gt.f32.partialorder %v3417_v18, 0.0  ;;  %v1932_v2 = vpack.c.bf16 %v3471_v63, %v3458_v44 }
 0x3f4   :  { %v1873_v49 = vpop.f32.mrb[62].mxu1  ;;  %v2546_v19 = vpop.eup %2545  ;;  %v1466_v61 = vadd.f32 1.0, %v2544_v54  ;;  %vm1887_vm0 = vcmp.gt.f32.partialorder %v3445_v38, 0.0  ;;  %v1870_v12 = vadd.f32 %v1869_v10, %v3373_v45  ;;  %v3483_v40 = vadd.f32 %v1828_v4, %v3373_v45 }
 0x3f5   :  { %v1832_v25 = vpop.f32.mrb[63].mxu0  ;;  %v3474_v5 = vpop.f32.mrb[63].mxu1  ;;  %v1468_v8 = vadd.f32 1.0, %v2546_v19  ;;  %vm1889_vm1 = vcmp.gt.f32.partialorder %v3448_v27, 0.0  ;;  %vm1882_vm3 = vcmp.gt.f32.partialorder %v1827_v1, 0.0  ;;  %v1872_v53 = vadd.f32 %v1871_v51, %v3373_v45 }
 0x3f6   :  { %v2548_v6 = vpop.eup %2547  ;;  %2563 = vrcp.f32 %v1466_v61  ;;  %v1898_v33 = vmul.f32 0.01, %v1827_v1  ;;  %vm1884_vm4 = vcmp.gt.f32.partialorder %v1870_v12, 0.0  ;;  %v1900_v17 = vmul.f32 0.01, %v1870_v12 }
 0x3f7   :  { %v2550_v9 = vpop.eup %2549  ;;  %v1467_v13 = vadd.f32 1.0, %v2548_v6  ;;  %2565 = vrcp.f32 %v1468_v8  ;;  %vm1883_vm5 = vcmp.gt.f32.partialorder %v3483_v40, 0.0  ;;  %v1899_v28 = vmul.f32 0.01, %v3483_v40 }
 0x3f8   :  { %v2552_v15 = vpop.eup %2551  ;;  %v1593_v16 = vrot.slane %v2550_v9, 1  ;;  %v3486_v21 = vsel %vm1882_vm3, %v1827_v1, %v1898_v33  ;;  %v3489_v26 = vsel %vm1884_vm4, %v1870_v12, %v1900_v17  ;;  %v1831_v22 = vadd.f32 %v1830_v52, %v3375_v46 }
 0x3f9   :  { %v2554_v7 = vpop.eup %2553  ;;  %2567 = vrcp.f32 %v1467_v13  ;;  %v1469_v20 = vadd.f32 1.0, %v2552_v15  ;;  %v1874_v35 = vadd.f32 %v1873_v49, %v3375_v46  ;;  %vm1885_vm6 = vcmp.gt.f32.partialorder %v1872_v53, 0.0 }
 0x3fa   :  { %v2556_v24 = vpop.eup %2555  ;;  %v1599_v14 = vrot.slane %v2554_v7, 1  ;;  %v1901_v42 = vmul.f32 0.01, %v1872_v53  ;;  %v1833_v10 = vadd.f32 %v1832_v25, %v3375_v46  ;;  %vm1890_vm7 = vcmp.gt.f32.partialorder %v1831_v22, 0.0 }
 0x3fb   :  { %v2558_v32 = vpop.eup %2557  ;;  %2569 = vrcp.f32 %v1469_v20  ;;  %v1591_v56 = vrot.slane %v2556_v24, 1  ;;  %v1906_v51 = vmul.f32 0.01, %v1831_v22  ;;  %vm1892_vm8 = vcmp.gt.f32.partialorder %v1874_v35, 0.0 }
 0x3fc   :  { %v2560_v37 = vpop.eup %2559  ;;  %v1597_v36 = vrot.slane %v2558_v32, 1  ;;  %v1908_v49 = vmul.f32 0.01, %v1874_v35  ;;  %vm1891_vm9 = vcmp.gt.f32.partialorder %v1833_v10, 0.0  ;;  %v1907_v30 = vmul.f32 0.01, %v1833_v10 }
 0x3fd   :  { %v2562_v4 = vpop.eup %2561  ;;  %v1592_v57 = vsel %vm1577_vm2, %v1590_v11, %v1591_v56  ;;  %1630 = vst [vmem:[#allocation6 + $0x60] sm:$0xf] %v1591_v56  ;;  %v1594_v45 = vrot.slane %v2560_v37, 1  ;;  %v1922_v61 = vsel %vm1890_vm7, %v1831_v22, %v1906_v51  ;;  %v1911_v12 = vsel %vm1879_vm14, %v3414_v50, %v3432_v34 }
 0x3fe   :  { %1622 = vst [vmem:[#allocation6 + $0x20] sm:$0xff] %v1592_v57  ;;  %v1598_v52 = vsel %vm1577_vm2, %v1596_v58, %v1597_v36  ;;  %1632 = vst [vmem:[#allocation6 + $0x70] sm:$0xf] %v1597_v36  ;;  %v1600_v54 = vrot.slane %v2562_v4, 1  ;;  %v1934_v1 = vpack.c.bf16 %v1922_v61, %v3486_v21  ;;  %v1924_v25 = vsel %vm1892_vm8, %v1874_v35, %v1908_v49 }
 0x3ff   :  { %1624 = vst [vmem:[#allocation6 + $0x30] sm:$0xff] %v1598_v52  ;;  %v1595_v19 = vsel %vm1577_vm2, %v1593_v16, %v1594_v45  ;;  %1631 = vst [vmem:[#allocation6 + $0x68] sm:$0xf] %v1594_v45  ;;  %v1876_v58 = vadd.f32 %v3474_v5, %v3375_v46  ;;  %v1936_v8 = vpack.c.bf16 %v1924_v25, %v3489_v26  ;;  %vm1953_vm10 = vcmask 130048  }
 0x400   :  { %1623 = vst [vmem:[#allocation6 + $0x28] sm:$0xff] %v1595_v19  ;;  %v1601_v11 = vsel %vm1577_vm2, %v1599_v14, %v1600_v54  ;;  %1633 = vst [vmem:[#allocation6 + $0x78] sm:$0xf] %v1600_v54  ;;  %v2564_v6 = vpop.eup %2563  ;;  %v1919_v9 = vsel %vm1887_vm0, %v3445_v38, %v3464_v60  ;;  %v1913_v13 = vsel %vm1881_vm15, %v3417_v18, %v3438_v31  ;;  %v2506_v18 = vld [vmem:[%s3640_s12] sm:$0xff]  }
 0x401   :  { %1625 = vst [vmem:[#allocation6 + $0x38] sm:$0xff] %v1601_v11  ;;  %v2566_v46 = vpop.eup %2565  ;;  %vm1893_vm2 = vcmp.gt.f32.partialorder %v1876_v58, 0.0  ;;  %v1909_v5 = vmul.f32 0.01, %v1876_v58  ;;  %v1931_v33 = vpack.c.bf16 %v1919_v9, %v1911_v12  ;;  %v1921_v15 = vsel %vm1889_vm1, %v3448_v27, %v3467_v55 }
 0x402   :  { %v1933_v34 = vpack.c.bf16 %v1921_v15, %v1913_v13  ;;  %v1915_v38 = vsel %vm1883_vm5, %v3483_v40, %v1899_v28  ;;  %v1923_v60 = vsel %vm1891_vm9, %v1833_v10, %v1907_v30  ;;  %v1917_v16 = vsel %vm1885_vm6, %v1872_v53, %v1901_v42 }
 0x403   :  { %v2568_v50 = vpop.eup %2567  ;;  %1957 = vmatprep.subr.bf16.mxu0 %v1931_v33  ;;  %v1935_v31 = vpack.c.bf16 %v1923_v60, %v1915_v38  ;;  %v1925_v17 = vsel %vm1893_vm2, %v1876_v58, %v1909_v5  ;;  %v1494_v27 = vcombine.low %v3428_v23, %v3434_v29  ;;  %v1495_v55 = vcombine.low %v3450_v39, %v3455_v43 }
 0x404   :  { %2000 = vmatprep.subr.bf16.mxu1 %v1933_v34  ;;  %1958 = vmatpush1.bf16.msra.mxu0 %v1930_v62  ;;  %v1937_v40 = vpack.c.bf16 %v1925_v17, %v1917_v16  ;;  %v1496_v20 = vcombine.low %v2564_v6, %v2568_v50 }
 0x405   :  { %v2570_v7 = vpop.eup %2569  ;;  %2001 = vmatpush1.bf16.msra.mxu1 %v1932_v2  ;;  %2043 = vmatprep.subr.bf16.mxu0 %v1935_v31  ;;  %v1504_v23 = vrot.slane %v1494_v27, %v3423_v3  ;;  %v1511_v29 = vrot.slane %v1495_v55, %v3423_v3 }
 0x406   :  { %v1497_v21 = vcombine.low %v2566_v46, %v2570_v7  ;;  %2086 = vmatprep.subr.bf16.mxu1 %v1937_v40  ;;  %v1518_v39 = vrot.slane %v1496_v20, %v3423_v3 }
 0x407   :  { %2480 = vmatmul.mubr.msk.bf16.vlgmr.msra.gmra.mrb[64].mxu0 %vm1953_vm10, %v2506_v18  ;;  %v1526_v43 = vcombine.low %v1504_v23, %v1511_v29 }
 0x408   :  { %v1525_v41 = vrot.slane %v1497_v21, %v3423_v3  ;;  %2481 = vmatmul.mubr.msk.bf16.vlgmr.msra.gmra.mrb[64].mxu1 %vm1953_vm10, %v2506_v18  ;;  %2044 = vmatpush1.bf16.msra.mxu0 %v1934_v1 }
 0x409   :  { %2087 = vmatpush1.bf16.msra.mxu1 %v1936_v8  ;;  %2075 = vmatprep.mubr.bf16.mxu0 %v2684_v0  ;;  %v1534_v59 = vrot.slane %v1526_v43, %v3423_v3 }
 0x40a   :  { %v1527_v44 = vcombine.low %v1518_v39, %v1525_v41  ;;  %2118 = vmatprep.mubr.bf16.mxu1 %v2684_v0 }
 0x40c   :  { %v1541_v62 = vrot.slane %v1527_v44, %v3423_v3 }
 0x40e   :  { %v1542_v63 = vcombine.low %v1534_v59, %v1541_v62 }
 0x40f   :  { %2482 = vmatmul.mubr.msk.bf16.vlgmr.msra.gmra.mrb[68].mxu0 %vm1953_vm10, %v2506_v18 }
 0x410   :  { %1544 = vst [vmem:[#allocation5] sm:$0xff] %v1542_v63  ;;  %2483 = vmatmul.mubr.msk.bf16.vlgmr.msra.gmra.mrb[68].mxu1 %vm1953_vm10, %v2506_v18  ;;  %2227 = vmatprep.mubr.bf16.mxu0 %v2684_v0 }
 0x411   :  { %2268 = vmatprep.mubr.bf16.mxu1 %v2684_v0 }
 0x4da   :  { %v1991_v2 = vpop.f32.mrb[64].mxu0 }
 0x4db   :  { %v1992_v24 = vadd.f32 %v1991_v2, %v3377_v47  ;;  %v2034_v14 = vpop.f32.mrb[64].mxu1  ;;  %v1993_v26 = vpop.f32.mrb[65].mxu0 }
 0x4dc   :  { %v2035_v28 = vadd.f32 %v2034_v14, %v3377_v47  ;;  %v1994_v53 = vadd.f32 %v1993_v26, %v3377_v47  ;;  %v2036_v3 = vpop.f32.mrb[65].mxu1  ;;  %v1995_v32 = vpop.f32.mrb[66].mxu0 }
 0x4dd   :  { %v2145_v56 = vmul.f32 0.01, %v1992_v24  ;;  %v2037_v22 = vadd.f32 %v2036_v3, %v3377_v47  ;;  %v1996_v35 = vadd.f32 %v1995_v32, %v3379_v48  ;;  %v2038_v37 = vpop.f32.mrb[66].mxu1  ;;  %v1997_v36 = vpop.f32.mrb[67].mxu0  ;;  %vm2129_vm11 = vcmp.gt.f32.partialorder %v1992_v24, 0.0 }
 0x4de   :  { %vm2131_vm12 = vcmp.gt.f32.partialorder %v2035_v28, 0.0  ;;  %v2147_v42 = vmul.f32 0.01, %v2035_v28  ;;  %v2146_v10 = vmul.f32 0.01, %v1994_v53  ;;  %vm2130_vm13 = vcmp.gt.f32.partialorder %v1994_v53, 0.0 }
 0x4df   :  { %v2148_v4 = vmul.f32 0.01, %v2037_v22  ;;  %vm2137_vm14 = vcmp.gt.f32.partialorder %v1996_v35, 0.0  ;;  %v2040_v57 = vpop.f32.mrb[67].mxu1  ;;  %vm2132_vm15 = vcmp.gt.f32.partialorder %v2037_v22, 0.0  ;;  %v2039_v51 = vadd.f32 %v2038_v37, %v3379_v48 }
 0x4e0   :  { %v2153_v45 = vmul.f32 0.01, %v1996_v35  ;;  %v1998_v52 = vadd.f32 %v1997_v36, %v3379_v48  ;;  %v2161_v54 = vsel %vm2129_vm11, %v1992_v24, %v2145_v56  ;;  %v3561_v49 = vsel %vm2131_vm12, %v2035_v28, %v2147_v42 }
 0x4e1   :  { %v2041_v19 = vadd.f32 %v2040_v57, %v3379_v48  ;;  %vm2139_vm0 = vcmp.gt.f32.partialorder %v2039_v51, 0.0  ;;  %v2155_v30 = vmul.f32 0.01, %v2039_v51  ;;  %v2162_v1 = vsel %vm2130_vm13, %v1994_v53, %v2146_v10 }
 0x4e2   :  { %v2169_v61 = vsel %vm2137_vm14, %v1996_v35, %v2153_v45  ;;  %v2077_v11 = vpop.f32.mrb[68].mxu0  ;;  %vm2138_vm1 = vcmp.gt.f32.partialorder %v1998_v52, 0.0  ;;  %v2154_v58 = vmul.f32 0.01, %v1998_v52  ;;  %v2164_v8 = vsel %vm2132_vm15, %v2037_v22, %v2148_v4 }
 0x4e3   :  { %v2179_v25 = vpack.c.bf16 %v2169_v61, %v2161_v54  ;;  %v2120_v6 = vpop.f32.mrb[68].mxu1  ;;  %v2171_v12 = vsel %vm2139_vm0, %v2039_v51, %v2155_v30  ;;  %vm2140_vm3 = vcmp.gt.f32.partialorder %v2041_v19, 0.0  ;;  %v2078_v9 = vadd.f32 %v2077_v11, %v3377_v47  ;;  %v2079_v46 = vpop.f32.mrb[69].mxu0 }
 0x4e4   :  { %v2121_v13 = vadd.f32 %v2120_v6, %v3377_v47  ;;  %v2122_v5 = vpop.f32.mrb[69].mxu1  ;;  %v2181_v33 = vpack.c.bf16 %v2171_v12, %v3561_v49  ;;  %v2156_v15 = vmul.f32 0.01, %v2041_v19  ;;  %v2080_v50 = vadd.f32 %v2079_v46, %v3377_v47  ;;  %v2081_v38 = vpop.f32.mrb[70].mxu0 }
 0x4e5   :  { %v2123_v34 = vadd.f32 %v2122_v5, %v3377_v47  ;;  %v2124_v60 = vpop.f32.mrb[70].mxu1  ;;  %vm2133_vm4 = vcmp.gt.f32.partialorder %v2078_v9, 0.0  ;;  %v2149_v16 = vmul.f32 0.01, %v2078_v9  ;;  %v2170_v18 = vsel %vm2138_vm1, %v1998_v52, %v2154_v58  ;;  %v2083_v20 = vpop.f32.mrb[71].mxu0 }
 0x4e6   :  { %vm2135_vm5 = vcmp.gt.f32.partialorder %v2121_v13, 0.0  ;;  %v2151_v31 = vmul.f32 0.01, %v2121_v13  ;;  %vm2134_vm6 = vcmp.gt.f32.partialorder %v2080_v50, 0.0  ;;  %v2150_v17 = vmul.f32 0.01, %v2080_v50 }
 0x4e7   :  { %vm2136_vm7 = vcmp.gt.f32.partialorder %v2123_v34, 0.0  ;;  %v2165_v27 = vsel %vm2133_vm4, %v2078_v9, %v2149_v16  ;;  %v2152_v55 = vmul.f32 0.01, %v2123_v34  ;;  %v2082_v7 = vadd.f32 %v2081_v38, %v3379_v48  ;;  %v2126_v21 = vpop.f32.mrb[71].mxu1 }
 0x4e8   :  { %v2125_v40 = vadd.f32 %v2124_v60, %v3379_v48  ;;  %v2084_v47 = vadd.f32 %v2083_v20, %v3379_v48  ;;  %v2127_v23 = vadd.f32 %v2126_v21, %v3379_v48  ;;  %v2180_v29 = vpack.c.bf16 %v2170_v18, %v2162_v1  ;;  %v2177_v48 = vld [vmem:[%s3642_s14] sm:$0x3]  ;;  %s2686_s14 = smov [#allocation6]  }
 0x4e9   :  { %v2172_v39 = vsel %vm2140_vm3, %v2041_v19, %v2156_v15  ;;  %vm2141_vm8 = vcmp.gt.f32.partialorder %v2082_v7, 0.0  ;;  %v2157_v41 = vmul.f32 0.01, %v2082_v7  ;;  %v2167_v62 = vsel %vm2135_vm5, %v2121_v13, %v2151_v31  ;;  %s2402_s11 = sshll.u32 %s2686_s14, 4  ;;  %s2403_s11 = int_to_ptr.vmem [resolvable:$true] %s2402_s11 }
 0x4ea   :  { %vm2143_vm9 = vcmp.gt.f32.partialorder %v2125_v40, 0.0  ;;  %v2159_v43 = vmul.f32 0.01, %v2125_v40  ;;  %vm2142_vm2 = vcmp.gt.f32.partialorder %v2084_v47, 0.0  ;;  %v2158_v44 = vmul.f32 0.01, %v2084_v47  ;;  %2195 = vmatprep.subr.bf16.mxu0 %v2180_v29  ;;  %p2614_p9 = scmp.lt.s32.totalorder %s2403_s11, %s2403_s11 }
 0x4eb   :  { %vm2144_vm11 = vcmp.gt.f32.partialorder %v2127_v23, 0.0  ;;  %v2160_v59 = vmul.f32 0.01, %v2127_v23  ;;  %v2173_v63 = vsel %vm2141_vm8, %v2082_v7, %v2157_v41  ;;  %v2182_v24 = vpack.c.bf16 %v2172_v39, %v2164_v8  ;;  %2196 = vmatpush1.bf16.msra.mxu0 %v2179_v25  ;;  %s2609_s4 = scalar_lea.vmem %s2403_s11, 2048 }
 0x4ec   :  { %v2175_v2 = vsel %vm2143_vm9, %v2125_v40, %v2159_v43  ;;  %v2183_v14 = vpack.c.bf16 %v2173_v63, %v2165_v27  ;;  %v2166_v28 = vsel %vm2134_vm6, %v2080_v50, %v2150_v17  ;;  %v2174_v53 = vsel %vm2142_vm2, %v2084_v47, %v2158_v44  ;;  %p2610_p8 = scmp.ne.s32.totalorder %s2403_s11, %s2609_s4  ;;  %p2615_p10 = scmp.lt.s32.totalorder %s2609_s4, %s2609_s4 }
 0x4ed   :  { %v2185_v26 = vpack.c.bf16 %v2175_v2, %v2167_v62  ;;  %2236 = vmatprep.subr.bf16.mxu1 %v2182_v24  ;;  %v2184_v3 = vpack.c.bf16 %v2174_v53, %v2166_v28  ;;  %v2168_v32 = vsel %vm2136_vm7, %v2123_v34, %v2152_v55  ;;  %v2176_v56 = vsel %vm2144_vm11, %v2127_v23, %v2160_v59 }
 0x4ee   :  { %2237 = vmatpush1.bf16.msra.mxu1 %v2181_v33  ;;  %2484 = vmatmul.mubr.msk.bf16.vlgmr.msra.gmra.mrb[72].mxu0 %vm1953_vm10, %v2177_v48  ;;  %v2186_v22 = vpack.c.bf16 %v2176_v56, %v2168_v32  ;;  %p2616_p11 = por %p2615_p10, %p2614_p9 }
 0x4ef   :  { %2277 = vmatprep.subr.bf16.mxu0 %v2184_v3  ;;  %2309 = vmatprep.mubr.bf16.mxu0 %v2684_v0 }
 0x4f0   :  { %2318 = vmatprep.subr.bf16.mxu1 %v2186_v22  ;;  %2278 = vmatpush1.bf16.msra.mxu0 %v2183_v14  ;;  %p2617_p12 = pnand %p2616_p11, %p2610_p8 }
 0x4f1   :  { %2485 = vmatmul.mubr.msk.bf16.vlgmr.msra.gmra.mrb[72].mxu1 %vm1953_vm10, %v2177_v48 }
 0x4f2   :  { %2319 = vmatpush1.bf16.msra.mxu1 %v2185_v26  ;;  %2350 = vmatprep.mubr.bf16.mxu1 %v2684_v0 }
 0x4f6   :  { %2486 = vmatmul.mubr.msk.bf16.vlgmr.msra.gmra.mrb[76].mxu0 %vm1953_vm10, %v2177_v48 }
 0x4f9   :  { %2487 = vmatmul.mubr.msk.bf16.vlgmr.msra.gmra.mrb[76].mxu1 %vm1953_vm10, %v2177_v48 }
 0x4fa   :  { %2620 = shalt.err (!%p2617_p12)
}
 0x4fb   :  { %s2621_s28 = scalar_lea.hbm %s3645_s17, 2048 }
 0x4fc   :  { %p2622_p13 = scmp.ne.s32.totalorder %s3645_s17, %s2621_s28  ;;  %p2625_p0 = scmp.lt.u32.totalorder %s2621_s28, %s3645_s17 }
 0x4fe   :  { %p2627_p1 = pnand %p2625_p0, %p2622_p13 }
 0x500   :  { %2630 = shalt.err (!%p2627_p1)
}
 0x501   :  { %2408 = dma.vmem_to_hbm [thread:$0]  %s2403_s11, 2048, %s3645_s17, [#allocation7], %s2682_s23, %s2682_s23, %s2683_s24  }
 0x502   :  { %s2631_s7 = scalar_lea.vmem %s2394_s15, 128  ;;  %p2636_p3 = scmp.lt.s32.totalorder %s2394_s15, %s2394_s15 }
 0x503   :  { %p2632_p2 = scmp.ne.s32.totalorder %s2394_s15, %s2631_s7  ;;  %p2637_p4 = scmp.lt.s32.totalorder %s2631_s7, %s2631_s7 }
 0x505   :  { %p2638_p5 = por %p2637_p4, %p2636_p3 }
 0x507   :  { %p2639_p6 = pnand %p2638_p5, %p2632_p2 }
 0x509   :  { %2642 = shalt.err (!%p2639_p6)
}
 0x50a   :  { %s2643_s21 = scalar_lea.hbm %s3644_s16, 128 }
 0x50b   :  { %p2644_p7 = scmp.ne.s32.totalorder %s3644_s16, %s2643_s21  ;;  %p2647_p8 = scmp.lt.u32.totalorder %s2643_s21, %s3644_s16 }
 0x50d   :  { %p2649_p9 = pnand %p2647_p8, %p2644_p7 }
 0x50f   :  { %2652 = shalt.err (!%p2649_p9)
}
 0x510   :  { %2396 = dma.vmem_to_hbm [thread:$0]  %s2394_s15, 128, %s3644_s16, [#allocation4]   ;;  %v2190_v0 = vpop.permute.xlu0 %2189 }
 0x511   :  { %s2688_s16 = smov [#allocation8]  }
 0x512   :  { %s2415_s24 = sshll.u32 %s2688_s16, 4  ;;  %s2416_s24 = int_to_ptr.vmem [resolvable:$true] %s2415_s24 }
 0x513   :  { %s2653_s10 = scalar_lea.vmem %s2416_s24, 512  ;;  %p2658_p11 = scmp.lt.s32.totalorder %s2416_s24, %s2416_s24 }
 0x514   :  { %p2654_p10 = scmp.ne.s32.totalorder %s2416_s24, %s2653_s10  ;;  %p2659_p12 = scmp.lt.s32.totalorder %s2653_s10, %s2653_s10 }
 0x516   :  { %p2660_p13 = por %p2659_p12, %p2658_p11 }
 0x518   :  { %p2661_p0 = pnand %p2660_p13, %p2654_p10 }
 0x5c1   :  { %v2229_v35 = vpop.f32.mrb[72].mxu0 }
 0x5c2   :  { %v2230_v37 = vadd.f32 %v2229_v35, %v2190_v0  ;;  %v2231_v36 = vpop.f32.mrb[73].mxu0 }
 0x5c3   :  { %v2232_v42 = vadd.f32 %v2231_v36, %v2190_v0  ;;  %v2233_v10 = vpop.f32.mrb[74].mxu0 }
 0x5c4   :  { %2571 = vtanh.f32 %v2230_v37  ;;  %v2270_v4 = vpop.f32.mrb[72].mxu1  ;;  %v2234_v57 = vpop.f32.mrb[75].mxu0 }
 0x5c5   :  { %v2271_v45 = vadd.f32 %v2270_v4, %v2190_v0  ;;  %2573 = vtanh.f32 %v2232_v42  ;;  %v2272_v51 = vpop.f32.mrb[73].mxu1 }
 0x5c6   :  { %v2273_v52 = vadd.f32 %v2272_v51, %v2190_v0  ;;  %v2274_v54 = vpop.f32.mrb[74].mxu1 }
 0x5c7   :  { %2575 = vtanh.f32 %v2271_v45  ;;  %v2275_v49 = vpop.f32.mrb[75].mxu1 }
 0x5c8   :  { %2577 = vtanh.f32 %v2273_v52 }
 0x5c9   :  { %v2311_v19 = vpop.f32.mrb[76].mxu0 }
 0x5ca   :  { %v2312_v61 = vadd.f32 %v2311_v19, %v2190_v0  ;;  %v2313_v30 = vpop.f32.mrb[77].mxu0 }
 0x5cb   :  { %v2314_v11 = vadd.f32 %v2313_v30, %v2190_v0  ;;  %v2315_v1 = vpop.f32.mrb[78].mxu0 }
 0x5cc   :  { %2579 = vtanh.f32 %v2312_v61  ;;  %v2352_v25 = vpop.f32.mrb[76].mxu1  ;;  %v2316_v58 = vpop.f32.mrb[79].mxu0 }
 0x5cd   :  { %v2353_v6 = vadd.f32 %v2352_v25, %v2190_v0  ;;  %2581 = vtanh.f32 %v2314_v11  ;;  %v2354_v8 = vpop.f32.mrb[77].mxu1 }
 0x5ce   :  { %v2572_v12 = vpop.eup %2571  ;;  %v2355_v9 = vadd.f32 %v2354_v8, %v2190_v0  ;;  %v2356_v13 = vpop.f32.mrb[78].mxu1 }
 0x5cf   :  { %v2574_v46 = vpop.eup %2573  ;;  %2583 = vtanh.f32 %v2353_v6  ;;  %v2357_v5 = vpop.f32.mrb[79].mxu1 }
 0x5d0   :  { %v2375_v33 = vcombine.low %v2572_v12, %v2574_v46  ;;  %2585 = vtanh.f32 %v2355_v9 }
 0x5d1   :  { %v2576_v15 = vpop.eup %2575 }
 0x5d2   :  { %v2578_v50 = vpop.eup %2577  ;;  %2383 = vst [vmem:[#allocation8] sm:$0xff] %v2375_v33 }
 0x5d3   :  { %v2376_v34 = vcombine.low %v2576_v15, %v2578_v50 }
 0x5d5   :  { %2384 = vst [vmem:[#allocation8 + $0x8] sm:$0xff] %v2376_v34 }
 0x5d6   :  { %v2580_v38 = vpop.eup %2579 }
 0x5d7   :  { %v2582_v60 = vpop.eup %2581 }
 0x5d8   :  { %v2377_v16 = vcombine.low %v2580_v38, %v2582_v60 }
 0x5d9   :  { %v2584_v18 = vpop.eup %2583 }
 0x5da   :  { %v2586_v31 = vpop.eup %2585  ;;  %2385 = vst [vmem:[#allocation8 + $0x10] sm:$0xff] %v2377_v16 }
 0x5db   :  { %v2378_v17 = vcombine.low %v2584_v18, %v2586_v31 }
 0x5dd   :  { %2386 = vst [vmem:[#allocation8 + $0x18] sm:$0xff] %v2378_v17 }
 0x5de   :  { %2664 = shalt.err (!%p2661_p0)
}
 0x5df   :  { %s2665_s9 = scalar_lea.hbm %s3646_s18, 512 }
 0x5e0   :  { %p2666_p1 = scmp.ne.s32.totalorder %s3646_s18, %s2665_s9  ;;  %p2669_p2 = scmp.lt.u32.totalorder %s2665_s9, %s3646_s18 }
 0x5e2   :  { %p2671_p3 = pnand %p2669_p2, %p2666_p1 }
 0x5e4   :  { %2674 = shalt.err (!%p2671_p3)
}
 0x5e5   :  { %2418 = dma.vmem_to_hbm [thread:$0]  %s2416_s24, 512, %s3646_s18, [#allocation7]  }
 0x5e6   :  { %2677 = dma.done.wait [#allocation4], 128  }
 0x5e7   :  { %2678 = vsyncadd [#allocation4], 4294967168 }
 0x5e8   :  { %2679 = dma.done.wait [#allocation7], 2560  }
 0x5e9   :  { %2680 = vsyncadd [#allocation7], 4294964736 }
 0x5ea   :  { %2428 = vsyncpa [#allocation3], 1 }
 0x5eb   :  { %2429 = vsyncpa [#allocation4], 1 }
 0x5ec   :  { %2430 = vsyncpa [#allocation7], 1 }

</bundles_post_ra>
